<compile_context>
chip_gen: v7x
topology: tpu7x:2x2x1
jax: 0.10.0
libtpu: 0.0.40
codegen_flags: <defaults>
</compile_context>

<pallas_src>
import jax
import jax.numpy as jnp
from jax.experimental import pallas as pl
from jax.experimental.pallas import tpu as pltpu

# ----- small, forward-consistent hyperparameters -----
COUNT      = 2      # GRoIE branch count
NUM_LAYERS = 4      # number of encoder hidden states in `layers`
B          = 2      # batch
S          = 8      # sequence length
H          = 32     # config.hidden_size
NUM_HEADS  = 4
HEAD_DIM   = H // NUM_HEADS
INTER      = 64     # config.intermediate_size
L          = 5      # num_labels
LN_EPS     = 1e-12  # BERT LayerNorm eps
VW         = max(3 * H, INTER)   # packed bias/LN slab width (= 96)


def _layer_norm(x, g, b):
    mu = jnp.mean(x, axis=-1, keepdims=True)
    xc = x - mu
    var = jnp.mean(xc * xc, axis=-1, keepdims=True)
    return xc * jax.lax.rsqrt(var + LN_EPS) * g + b


def groie_kernel(x_ref, mask_ref, wqkv_ref, wao_ref, wi_ref, wo_ref,
                 vec_ref, wc_ref, bc_ref, out_ref):
    """Single program: everything resident in VMEM, all loops unrolled."""
    scale = 1.0 / float(HEAD_DIM) ** 0.5
    amask = mask_ref[...]          # (B, 1, S) additive attention mask
    wc = wc_ref[...]               # (H, L) shared classifier
    bc = bc_ref[...]               # (1, L)

    acc = jnp.zeros((B * S, L), jnp.float32)

    for c in range(COUNT):         # unrolled at trace time: branch c uses layers[-c-1]
        x2 = x_ref[c].reshape(B * S, H)          # (B*S, H)
        vecs = vec_ref[c]                        # (8, VW) packed bias/LN slab
        b_qkv = vecs[0:1, :]                     # (1, 3H)
        bao   = vecs[1:2, :H]
        g1    = vecs[2:3, :H]
        be1   = vecs[3:4, :H]
        bi    = vecs[4:5, :INTER]
        bo    = vecs[5:6, :H]
        g2    = vecs[6:7, :H]
        be2   = vecs[7:8, :H]

        # --- fused QKV projection: one (B*S, H) @ (H, 3H) matmul ---
        qkv = jnp.dot(x2, wqkv_ref[c], preferred_element_type=jnp.float32) + b_qkv

        # --- multi-head self-attention (heads unrolled, batch kept batched) ---
        attn = jnp.zeros((B * S, H), jnp.float32)
        for h in range(NUM_HEADS):
            lo = h * HEAD_DIM
            qh = qkv[:, lo:lo + HEAD_DIM].reshape(B, S, HEAD_DIM)
            kh = qkv[:, H + lo:H + lo + HEAD_DIM].reshape(B, S, HEAD_DIM)
            vh = qkv[:, 2 * H + lo:2 * H + lo + HEAD_DIM].reshape(B, S, HEAD_DIM)
            # scores without materializing a transpose
            s = jnp.einsum('bqd,bkd->bqk', qh, kh,
                           preferred_element_type=jnp.float32) * scale + amask
            m = jnp.max(s, axis=-1, keepdims=True)
            e = jnp.exp(s - m)
            p = e * pl.reciprocal(jnp.sum(e, axis=-1, keepdims=True), approx=True)
            ctx_h = jnp.einsum('bqk,bkd->bqd', p, vh,
                               preferred_element_type=jnp.float32)
            # per-head output projection: avoids the lane concatenate
            attn = attn + jnp.dot(ctx_h.reshape(B * S, HEAD_DIM), wao_ref[c, h],
                                  preferred_element_type=jnp.float32)

        # --- BertSelfOutput: dense bias + residual + LayerNorm ---
        h1 = _layer_norm(attn + bao + x2, g1, be1)

        # --- BertIntermediate + BertOutput ---
        inter = jax.nn.gelu(
            jnp.dot(h1, wi_ref[c], preferred_element_type=jnp.float32) + bi,
            approximate=True)
        ffn = jnp.dot(inter, wo_ref[c], preferred_element_type=jnp.float32) + bo
        h2 = _layer_norm(ffn + h1, g2, be2)

        # dropout: identity in eval mode
        # --- shared classifier, accumulated over branches ---
        acc = acc + jnp.dot(h2, wc, preferred_element_type=jnp.float32) + bc

    out_ref[...] = acc * (1.0 / COUNT)


def groie_forward(layers, attention_mask, params, labels=None):
    # branch c consumes layers[-c-1]
    branch_x = jnp.stack([layers[-c - 1] for c in range(COUNT)], axis=0)  # (COUNT,B,S,H)
    add_mask = ((1.0 - attention_mask.astype(jnp.float32)) * -10000.0)[:, None, :]  # (B,1,S)

    # fused QKV weight / bias
    w_qkv = jnp.concatenate([params["wq"], params["wk"], params["wv"]], axis=-1)  # (COUNT,H,3H)
    b_qkv = jnp.concatenate([params["bq"], params["bk"], params["bv"]], axis=-1)  # (COUNT,1,3H)
    # attention output weight, split per head along its input axis
    wao4 = params["wao"].reshape(COUNT, NUM_HEADS, HEAD_DIM, H)

    # pack the 8 small per-branch vectors into one (COUNT, 8, VW) slab
    def pad_vec(v):
        return jnp.pad(v, ((0, 0), (0, 0), (0, VW - v.shape[-1])))
    vecs = jnp.concatenate(
        [pad_vec(b_qkv), pad_vec(params["bao"]),
         pad_vec(params["ln1_g"]), pad_vec(params["ln1_b"]),
         pad_vec(params["bi"]), pad_vec(params["bo"]),
         pad_vec(params["ln2_g"]), pad_vec(params["ln2_b"])], axis=1)

    vmem = pl.BlockSpec(memory_space=pltpu.MemorySpace.VMEM)
    flat_logits = pl.pallas_call(
        groie_kernel,
        out_shape=jax.ShapeDtypeStruct((B * S, L), jnp.float32),
        in_specs=[vmem] * 9,
        out_specs=vmem,
    )(branch_x, add_mask, w_qkv, wao4, params["wi"], params["wo"],
      vecs, params["wc"], params["bc"])

    avg_logits = flat_logits.reshape(B, S, L)

    # labels=None path: torch.Tensor(0) is an empty tensor.
    total_loss = jnp.zeros((0,), jnp.float32)
    return -total_loss, avg_logits


def groie_reference(layers, attention_mask, params):
    """Pure-JAX reference mirroring the kernel semantics (labels=None path)."""
    add_mask = ((1.0 - attention_mask.astype(jnp.float32)) * -10000.0)[:, None, :]

    def ln(x, g, b):
        mu = jnp.mean(x, -1, keepdims=True)
        xc = x - mu
        var = jnp.mean(xc * xc, -1, keepdims=True)
        return xc * jax.lax.rsqrt(var + LN_EPS) * g + b

    acc = jnp.zeros((B, S, L), jnp.float32)
    for c in range(COUNT):
        x = layers[-c - 1]
        q = x @ params["wq"][c] + params["bq"][c]
        k = x @ params["wk"][c] + params["bk"][c]
        v = x @ params["wv"][c] + params["bv"][c]
        qh = q.reshape(B, S, NUM_HEADS, HEAD_DIM).transpose(0, 2, 1, 3)
        kh = k.reshape(B, S, NUM_HEADS, HEAD_DIM).transpose(0, 2, 1, 3)
        vh = v.reshape(B, S, NUM_HEADS, HEAD_DIM).transpose(0, 2, 1, 3)
        s = jnp.einsum("bhqd,bhkd->bhqk", qh, kh) / float(HEAD_DIM) ** 0.5
        s = s + add_mask[:, None, :, :]
        p = jax.nn.softmax(s, axis=-1)
        ctx = jnp.einsum("bhqk,bhkd->bhqd", p, vh).transpose(0, 2, 1, 3).reshape(B, S, H)
        attn = ctx @ params["wao"][c] + params["bao"][c]
        h1 = ln(attn + x, params["ln1_g"][c], params["ln1_b"][c])
        inter = jax.nn.gelu(h1 @ params["wi"][c] + params["bi"][c], approximate=True)
        ffn = inter @ params["wo"][c] + params["bo"][c]
        h2 = ln(ffn + h1, params["ln2_g"][c], params["ln2_b"][c])
        acc = acc + h2 @ params["wc"] + params["bc"]
    return acc / COUNT


def init_params(key):
    ks = iter(jax.random.split(key, 16))

    def rnd(shape):
        return jax.random.normal(next(ks), shape, jnp.float32) * 0.05

    return dict(
        wq=rnd((COUNT, H, H)),   bq=rnd((COUNT, 1, H)),
        wk=rnd((COUNT, H, H)),   bk=rnd((COUNT, 1, H)),
        wv=rnd((COUNT, H, H)),   bv=rnd((COUNT, 1, H)),
        wao=rnd((COUNT, H, H)),  bao=rnd((COUNT, 1, H)),
        ln1_g=jnp.ones((COUNT, 1, H), jnp.float32),
        ln1_b=jnp.zeros((COUNT, 1, H), jnp.float32),
        wi=rnd((COUNT, H, INTER)), bi=rnd((COUNT, 1, INTER)),
        wo=rnd((COUNT, INTER, H)), bo=rnd((COUNT, 1, H)),
        ln2_g=jnp.ones((COUNT, 1, H), jnp.float32),
        ln2_b=jnp.zeros((COUNT, 1, H), jnp.float32),
        wc=rnd((H, L)), bc=rnd((1, L)),
    )


if __name__ == "__main__":
    key = jax.random.PRNGKey(0)
    k_params, k_layers = jax.random.split(key)
    params = init_params(k_params)

    layer_keys = jax.random.split(k_layers, NUM_LAYERS)
    layers = [jax.random.normal(k, (B, S, H), jnp.float32) for k in layer_keys]
    attention_mask = jnp.ones((B, S), jnp.float32).at[1, 6:].set(0.0)  # pad 2 tokens in batch 1

    neg_loss, avg_logits = groie_forward(layers, attention_mask, params, labels=None)
    avg_logits = jax.block_until_ready(avg_logits)

    ref = groie_reference(layers, attention_mask, params)
    assert avg_logits.shape == (B, S, L), avg_logits.shape
    assert neg_loss.shape == (0,)
    max_err = float(jnp.max(jnp.abs(avg_logits - ref)))
    # tolerance covers the EUP approx-reciprocal softmax denominator
    if max_err > 2e-3:
        raise AssertionError(f"kernel mismatch vs reference, max_err={max_err}")
    print("KERNEL_OK")
</pallas_src>

<mosaic_0001>
module attributes {stable_mosaic.version = 11 : i64} {
  func.func @groie_kernel(%arg0: memref<2x2x8x32xf32, #tpu.memory_space<vmem>>, %arg1: memref<2x1x8xf32, #tpu.memory_space<vmem>>, %arg2: memref<2x32x96xf32, #tpu.memory_space<vmem>>, %arg3: memref<2x4x8x32xf32, #tpu.memory_space<vmem>>, %arg4: memref<2x32x64xf32, #tpu.memory_space<vmem>>, %arg5: memref<2x64x32xf32, #tpu.memory_space<vmem>>, %arg6: memref<2x8x96xf32, #tpu.memory_space<vmem>>, %arg7: memref<32x5xf32, #tpu.memory_space<vmem>>, %arg8: memref<1x5xf32, #tpu.memory_space<vmem>>, %arg9: memref<16x5xf32, #tpu.memory_space<vmem>>) attributes {dimension_semantics = [], scalar_prefetch = 0 : i64, scratch_operands = 0 : i64, tpu.core_type = #tpu.core_type<tc>} {
    %c0 = arith.constant 0 : index
    %c0_0 = arith.constant 0 : index
    %c0_1 = arith.constant 0 : index
    %0 = vector.load %arg1[%c0, %c0_0, %c0_1] : memref<2x1x8xf32, #tpu.memory_space<vmem>>, vector<2x1x8xf32>
    %c0_2 = arith.constant 0 : index
    %c0_3 = arith.constant 0 : index
    %1 = vector.load %arg7[%c0_2, %c0_3] : memref<32x5xf32, #tpu.memory_space<vmem>>, vector<32x5xf32>
    %c0_4 = arith.constant 0 : index
    %c0_5 = arith.constant 0 : index
    %2 = vector.load %arg8[%c0_4, %c0_5] : memref<1x5xf32, #tpu.memory_space<vmem>>, vector<1x5xf32>
    %cst = arith.constant 0.000000e+00 : f32
    %3 = vector.broadcast %cst : f32 to vector<16x5xf32>
    %c0_6 = arith.constant 0 : index
    %c0_7 = arith.constant 0 : index
    %c0_8 = arith.constant 0 : index
    %c0_9 = arith.constant 0 : index
    %4 = vector.load %arg0[%c0_6, %c0_7, %c0_8, %c0_9] : memref<2x2x8x32xf32, #tpu.memory_space<vmem>>, vector<1x2x8x32xf32>
    %5 = vector.shape_cast %4 : vector<1x2x8x32xf32> to vector<2x8x32xf32>
    %6 = vector.shape_cast %5 : vector<2x8x32xf32> to vector<16x32xf32>
    %c0_10 = arith.constant 0 : index
    %c0_11 = arith.constant 0 : index
    %c0_12 = arith.constant 0 : index
    %7 = vector.load %arg6[%c0_10, %c0_11, %c0_12] : memref<2x8x96xf32, #tpu.memory_space<vmem>>, vector<1x8x96xf32>
    %8 = vector.shape_cast %7 : vector<1x8x96xf32> to vector<8x96xf32>
    %9 = vector.extract_strided_slice %8 {offsets = [0, 0], sizes = [1, 96], strides = [1, 1]} : vector<8x96xf32> to vector<1x96xf32>
    %10 = vector.extract_strided_slice %8 {offsets = [1, 0], sizes = [1, 32], strides = [1, 1]} : vector<8x96xf32> to vector<1x32xf32>
    %11 = vector.extract_strided_slice %8 {offsets = [2, 0], sizes = [1, 32], strides = [1, 1]} : vector<8x96xf32> to vector<1x32xf32>
    %12 = vector.extract_strided_slice %8 {offsets = [3, 0], sizes = [1, 32], strides = [1, 1]} : vector<8x96xf32> to vector<1x32xf32>
    %13 = vector.extract_strided_slice %8 {offsets = [4, 0], sizes = [1, 64], strides = [1, 1]} : vector<8x96xf32> to vector<1x64xf32>
    %14 = vector.extract_strided_slice %8 {offsets = [5, 0], sizes = [1, 32], strides = [1, 1]} : vector<8x96xf32> to vector<1x32xf32>
    %15 = vector.extract_strided_slice %8 {offsets = [6, 0], sizes = [1, 32], strides = [1, 1]} : vector<8x96xf32> to vector<1x32xf32>
    %16 = vector.extract_strided_slice %8 {offsets = [7, 0], sizes = [1, 32], strides = [1, 1]} : vector<8x96xf32> to vector<1x32xf32>
    %c0_13 = arith.constant 0 : index
    %c0_14 = arith.constant 0 : index
    %c0_15 = arith.constant 0 : index
    %17 = vector.load %arg2[%c0_13, %c0_14, %c0_15] : memref<2x32x96xf32, #tpu.memory_space<vmem>>, vector<1x32x96xf32>
    %18 = vector.shape_cast %17 : vector<1x32x96xf32> to vector<32x96xf32>
    %cst_16 = arith.constant dense<0.000000e+00> : vector<16x96xf32>
    %19 = tpu.matmul %6, %18, %cst_16 {dimension_numbers = #tpu.dot_dimension_numbers<[1], [0], [0], [1], [0, 0, 1, 1], [], []>} : vector<16x32xf32>, vector<32x96xf32>, vector<16x96xf32> -> vector<16x96xf32>
    %20 = vector.broadcast %9 : vector<1x96xf32> to vector<16x96xf32>
    %21 = arith.addf %19, %20 : vector<16x96xf32>
    %cst_17 = arith.constant 0.000000e+00 : f32
    %22 = vector.broadcast %cst_17 : f32 to vector<16x32xf32>
    %23 = vector.extract_strided_slice %21 {offsets = [0, 0], sizes = [16, 8], strides = [1, 1]} : vector<16x96xf32> to vector<16x8xf32>
    %24 = vector.shape_cast %23 : vector<16x8xf32> to vector<2x8x8xf32>
    %25 = vector.extract_strided_slice %21 {offsets = [0, 32], sizes = [16, 8], strides = [1, 1]} : vector<16x96xf32> to vector<16x8xf32>
    %26 = vector.shape_cast %25 : vector<16x8xf32> to vector<2x8x8xf32>
    %27 = vector.extract_strided_slice %21 {offsets = [0, 64], sizes = [16, 8], strides = [1, 1]} : vector<16x96xf32> to vector<16x8xf32>
    %28 = vector.shape_cast %27 : vector<16x8xf32> to vector<2x8x8xf32>
    "tpu.trace_start"() <{level = 10 : i32, message = "bqd,bkd->bqk"}> : () -> ()
    %cst_18 = arith.constant dense<0.000000e+00> : vector<2x8x8xf32>
    %29 = tpu.matmul %24, %26, %cst_18 {dimension_numbers = #tpu.dot_dimension_numbers<[2], [2], [1], [1], [0, 0, 0, 1, 1, 1], [0], [0]>} : vector<2x8x8xf32>, vector<2x8x8xf32>, vector<2x8x8xf32> -> vector<2x8x8xf32>
    "tpu.trace_stop"() : () -> ()
    %cst_19 = arith.constant 0.353553385 : f32
    %30 = vector.broadcast %cst_19 : f32 to vector<2x8x8xf32>
    %31 = arith.mulf %29, %30 : vector<2x8x8xf32>
    %32 = vector.broadcast %0 : vector<2x1x8xf32> to vector<2x8x8xf32>
    %33 = arith.addf %31, %32 : vector<2x8x8xf32>
    %cst_20 = arith.constant dense<0xFF800000> : vector<2x8xf32>
    %34 = vector.multi_reduction <maximumf>, %33, %cst_20 [2] : vector<2x8x8xf32> to vector<2x8xf32>
    %35 = vector.shape_cast %34 : vector<2x8xf32> to vector<2x8x1xf32>
    %36 = vector.broadcast %35 : vector<2x8x1xf32> to vector<2x8x8xf32>
    %37 = arith.subf %33, %36 : vector<2x8x8xf32>
    %38 = math.exp %37 : vector<2x8x8xf32>
    %cst_21 = arith.constant dense<0.000000e+00> : vector<2x8xf32>
    %39 = vector.multi_reduction <add>, %38, %cst_21 [2] : vector<2x8x8xf32> to vector<2x8xf32>
    %40 = vector.shape_cast %39 : vector<2x8xf32> to vector<2x8x1xf32>
    %41 = tpu.reciprocal %40 {approx = true} : vector<2x8x1xf32> -> vector<2x8x1xf32>
    %42 = vector.broadcast %41 : vector<2x8x1xf32> to vector<2x8x8xf32>
    %43 = arith.mulf %38, %42 : vector<2x8x8xf32>
    "tpu.trace_start"() <{level = 10 : i32, message = "bqk,bkd->bqd"}> : () -> ()
    %cst_22 = arith.constant dense<0.000000e+00> : vector<2x8x8xf32>
    %44 = tpu.matmul %43, %28, %cst_22 {dimension_numbers = #tpu.dot_dimension_numbers<[2], [1], [1], [2], [0, 0, 0, 1, 1, 2], [0], [0]>} : vector<2x8x8xf32>, vector<2x8x8xf32>, vector<2x8x8xf32> -> vector<2x8x8xf32>
    "tpu.trace_stop"() : () -> ()
    %45 = vector.shape_cast %44 : vector<2x8x8xf32> to vector<16x8xf32>
    %c0_23 = arith.constant 0 : index
    %c0_24 = arith.constant 0 : index
    %c0_25 = arith.constant 0 : index
    %c0_26 = arith.constant 0 : index
    %46 = vector.load %arg3[%c0_23, %c0_24, %c0_25, %c0_26] : memref<2x4x8x32xf32, #tpu.memory_space<vmem>>, vector<1x1x8x32xf32>
    %47 = vector.shape_cast %46 : vector<1x1x8x32xf32> to vector<8x32xf32>
    %cst_27 = arith.constant dense<0.000000e+00> : vector<16x32xf32>
    %48 = tpu.matmul %45, %47, %cst_27 {dimension_numbers = #tpu.dot_dimension_numbers<[1], [0], [0], [1], [0, 0, 1, 1], [], []>} : vector<16x8xf32>, vector<8x32xf32>, vector<16x32xf32> -> vector<16x32xf32>
    %49 = arith.addf %22, %48 : vector<16x32xf32>
    %50 = vector.extract_strided_slice %21 {offsets = [0, 8], sizes = [16, 8], strides = [1, 1]} : vector<16x96xf32> to vector<16x8xf32>
    %51 = vector.shape_cast %50 : vector<16x8xf32> to vector<2x8x8xf32>
    %52 = vector.extract_strided_slice %21 {offsets = [0, 40], sizes = [16, 8], strides = [1, 1]} : vector<16x96xf32> to vector<16x8xf32>
    %53 = vector.shape_cast %52 : vector<16x8xf32> to vector<2x8x8xf32>
    %54 = vector.extract_strided_slice %21 {offsets = [0, 72], sizes = [16, 8], strides = [1, 1]} : vector<16x96xf32> to vector<16x8xf32>
    %55 = vector.shape_cast %54 : vector<16x8xf32> to vector<2x8x8xf32>
    "tpu.trace_start"() <{level = 10 : i32, message = "bqd,bkd->bqk"}> : () -> ()
    %cst_28 = arith.constant dense<0.000000e+00> : vector<2x8x8xf32>
    %56 = tpu.matmul %51, %53, %cst_28 {dimension_numbers = #tpu.dot_dimension_numbers<[2], [2], [1], [1], [0, 0, 0, 1, 1, 1], [0], [0]>} : vector<2x8x8xf32>, vector<2x8x8xf32>, vector<2x8x8xf32> -> vector<2x8x8xf32>
    "tpu.trace_stop"() : () -> ()
    %cst_29 = arith.constant 0.353553385 : f32
    %57 = vector.broadcast %cst_29 : f32 to vector<2x8x8xf32>
    %58 = arith.mulf %56, %57 : vector<2x8x8xf32>
    %59 = vector.broadcast %0 : vector<2x1x8xf32> to vector<2x8x8xf32>
    %60 = arith.addf %58, %59 : vector<2x8x8xf32>
    %cst_30 = arith.constant dense<0xFF800000> : vector<2x8xf32>
    %61 = vector.multi_reduction <maximumf>, %60, %cst_30 [2] : vector<2x8x8xf32> to vector<2x8xf32>
    %62 = vector.shape_cast %61 : vector<2x8xf32> to vector<2x8x1xf32>
    %63 = vector.broadcast %62 : vector<2x8x1xf32> to vector<2x8x8xf32>
    %64 = arith.subf %60, %63 : vector<2x8x8xf32>
    %65 = math.exp %64 : vector<2x8x8xf32>
    %cst_31 = arith.constant dense<0.000000e+00> : vector<2x8xf32>
    %66 = vector.multi_reduction <add>, %65, %cst_31 [2] : vector<2x8x8xf32> to vector<2x8xf32>
    %67 = vector.shape_cast %66 : vector<2x8xf32> to vector<2x8x1xf32>
    %68 = tpu.reciprocal %67 {approx = true} : vector<2x8x1xf32> -> vector<2x8x1xf32>
    %69 = vector.broadcast %68 : vector<2x8x1xf32> to vector<2x8x8xf32>
    %70 = arith.mulf %65, %69 : vector<2x8x8xf32>
    "tpu.trace_start"() <{level = 10 : i32, message = "bqk,bkd->bqd"}> : () -> ()
    %cst_32 = arith.constant dense<0.000000e+00> : vector<2x8x8xf32>
    %71 = tpu.matmul %70, %55, %cst_32 {dimension_numbers = #tpu.dot_dimension_numbers<[2], [1], [1], [2], [0, 0, 0, 1, 1, 2], [0], [0]>} : vector<2x8x8xf32>, vector<2x8x8xf32>, vector<2x8x8xf32> -> vector<2x8x8xf32>
    "tpu.trace_stop"() : () -> ()
    %72 = vector.shape_cast %71 : vector<2x8x8xf32> to vector<16x8xf32>
    %c0_33 = arith.constant 0 : index
    %c1 = arith.constant 1 : index
    %c0_34 = arith.constant 0 : index
    %c0_35 = arith.constant 0 : index
    %73 = vector.load %arg3[%c0_33, %c1, %c0_34, %c0_35] : memref<2x4x8x32xf32, #tpu.memory_space<vmem>>, vector<1x1x8x32xf32>
    %74 = vector.shape_cast %73 : vector<1x1x8x32xf32> to vector<8x32xf32>
    %cst_36 = arith.constant dense<0.000000e+00> : vector<16x32xf32>
    %75 = tpu.matmul %72, %74, %cst_36 {dimension_numbers = #tpu.dot_dimension_numbers<[1], [0], [0], [1], [0, 0, 1, 1], [], []>} : vector<16x8xf32>, vector<8x32xf32>, vector<16x32xf32> -> vector<16x32xf32>
    %76 = arith.addf %49, %75 : vector<16x32xf32>
    %77 = vector.extract_strided_slice %21 {offsets = [0, 16], sizes = [16, 8], strides = [1, 1]} : vector<16x96xf32> to vector<16x8xf32>
    %78 = vector.shape_cast %77 : vector<16x8xf32> to vector<2x8x8xf32>
    %79 = vector.extract_strided_slice %21 {offsets = [0, 48], sizes = [16, 8], strides = [1, 1]} : vector<16x96xf32> to vector<16x8xf32>
    %80 = vector.shape_cast %79 : vector<16x8xf32> to vector<2x8x8xf32>
    %81 = vector.extract_strided_slice %21 {offsets = [0, 80], sizes = [16, 8], strides = [1, 1]} : vector<16x96xf32> to vector<16x8xf32>
    %82 = vector.shape_cast %81 : vector<16x8xf32> to vector<2x8x8xf32>
    "tpu.trace_start"() <{level = 10 : i32, message = "bqd,bkd->bqk"}> : () -> ()
    %cst_37 = arith.constant dense<0.000000e+00> : vector<2x8x8xf32>
    %83 = tpu.matmul %78, %80, %cst_37 {dimension_numbers = #tpu.dot_dimension_numbers<[2], [2], [1], [1], [0, 0, 0, 1, 1, 1], [0], [0]>} : vector<2x8x8xf32>, vector<2x8x8xf32>, vector<2x8x8xf32> -> vector<2x8x8xf32>
    "tpu.trace_stop"() : () -> ()
    %cst_38 = arith.constant 0.353553385 : f32
    %84 = vector.broadcast %cst_38 : f32 to vector<2x8x8xf32>
    %85 = arith.mulf %83, %84 : vector<2x8x8xf32>
    %86 = vector.broadcast %0 : vector<2x1x8xf32> to vector<2x8x8xf32>
    %87 = arith.addf %85, %86 : vector<2x8x8xf32>
    %cst_39 = arith.constant dense<0xFF800000> : vector<2x8xf32>
    %88 = vector.multi_reduction <maximumf>, %87, %cst_39 [2] : vector<2x8x8xf32> to vector<2x8xf32>
    %89 = vector.shape_cast %88 : vector<2x8xf32> to vector<2x8x1xf32>
    %90 = vector.broadcast %89 : vector<2x8x1xf32> to vector<2x8x8xf32>
    %91 = arith.subf %87, %90 : vector<2x8x8xf32>
    %92 = math.exp %91 : vector<2x8x8xf32>
    %cst_40 = arith.constant dense<0.000000e+00> : vector<2x8xf32>
    %93 = vector.multi_reduction <add>, %92, %cst_40 [2] : vector<2x8x8xf32> to vector<2x8xf32>
    %94 = vector.shape_cast %93 : vector<2x8xf32> to vector<2x8x1xf32>
    %95 = tpu.reciprocal %94 {approx = true} : vector<2x8x1xf32> -> vector<2x8x1xf32>
    %96 = vector.broadcast %95 : vector<2x8x1xf32> to vector<2x8x8xf32>
    %97 = arith.mulf %92, %96 : vector<2x8x8xf32>
    "tpu.trace_start"() <{level = 10 : i32, message = "bqk,bkd->bqd"}> : () -> ()
    %cst_41 = arith.constant dense<0.000000e+00> : vector<2x8x8xf32>
    %98 = tpu.matmul %97, %82, %cst_41 {dimension_numbers = #tpu.dot_dimension_numbers<[2], [1], [1], [2], [0, 0, 0, 1, 1, 2], [0], [0]>} : vector<2x8x8xf32>, vector<2x8x8xf32>, vector<2x8x8xf32> -> vector<2x8x8xf32>
    "tpu.trace_stop"() : () -> ()
    %99 = vector.shape_cast %98 : vector<2x8x8xf32> to vector<16x8xf32>
    %c0_42 = arith.constant 0 : index
    %c2 = arith.constant 2 : index
    %c0_43 = arith.constant 0 : index
    %c0_44 = arith.constant 0 : index
    %100 = vector.load %arg3[%c0_42, %c2, %c0_43, %c0_44] : memref<2x4x8x32xf32, #tpu.memory_space<vmem>>, vector<1x1x8x32xf32>
    %101 = vector.shape_cast %100 : vector<1x1x8x32xf32> to vector<8x32xf32>
    %cst_45 = arith.constant dense<0.000000e+00> : vector<16x32xf32>
    %102 = tpu.matmul %99, %101, %cst_45 {dimension_numbers = #tpu.dot_dimension_numbers<[1], [0], [0], [1], [0, 0, 1, 1], [], []>} : vector<16x8xf32>, vector<8x32xf32>, vector<16x32xf32> -> vector<16x32xf32>
    %103 = arith.addf %76, %102 : vector<16x32xf32>
    %104 = vector.extract_strided_slice %21 {offsets = [0, 24], sizes = [16, 8], strides = [1, 1]} : vector<16x96xf32> to vector<16x8xf32>
    %105 = vector.shape_cast %104 : vector<16x8xf32> to vector<2x8x8xf32>
    %106 = vector.extract_strided_slice %21 {offsets = [0, 56], sizes = [16, 8], strides = [1, 1]} : vector<16x96xf32> to vector<16x8xf32>
    %107 = vector.shape_cast %106 : vector<16x8xf32> to vector<2x8x8xf32>
    %108 = vector.extract_strided_slice %21 {offsets = [0, 88], sizes = [16, 8], strides = [1, 1]} : vector<16x96xf32> to vector<16x8xf32>
    %109 = vector.shape_cast %108 : vector<16x8xf32> to vector<2x8x8xf32>
    "tpu.trace_start"() <{level = 10 : i32, message = "bqd,bkd->bqk"}> : () -> ()
    %cst_46 = arith.constant dense<0.000000e+00> : vector<2x8x8xf32>
    %110 = tpu.matmul %105, %107, %cst_46 {dimension_numbers = #tpu.dot_dimension_numbers<[2], [2], [1], [1], [0, 0, 0, 1, 1, 1], [0], [0]>} : vector<2x8x8xf32>, vector<2x8x8xf32>, vector<2x8x8xf32> -> vector<2x8x8xf32>
    "tpu.trace_stop"() : () -> ()
    %cst_47 = arith.constant 0.353553385 : f32
    %111 = vector.broadcast %cst_47 : f32 to vector<2x8x8xf32>
    %112 = arith.mulf %110, %111 : vector<2x8x8xf32>
    %113 = vector.broadcast %0 : vector<2x1x8xf32> to vector<2x8x8xf32>
    %114 = arith.addf %112, %113 : vector<2x8x8xf32>
    %cst_48 = arith.constant dense<0xFF800000> : vector<2x8xf32>
    %115 = vector.multi_reduction <maximumf>, %114, %cst_48 [2] : vector<2x8x8xf32> to vector<2x8xf32>
    %116 = vector.shape_cast %115 : vector<2x8xf32> to vector<2x8x1xf32>
    %117 = vector.broadcast %116 : vector<2x8x1xf32> to vector<2x8x8xf32>
    %118 = arith.subf %114, %117 : vector<2x8x8xf32>
    %119 = math.exp %118 : vector<2x8x8xf32>
    %cst_49 = arith.constant dense<0.000000e+00> : vector<2x8xf32>
    %120 = vector.multi_reduction <add>, %119, %cst_49 [2] : vector<2x8x8xf32> to vector<2x8xf32>
    %121 = vector.shape_cast %120 : vector<2x8xf32> to vector<2x8x1xf32>
    %122 = tpu.reciprocal %121 {approx = true} : vector<2x8x1xf32> -> vector<2x8x1xf32>
    %123 = vector.broadcast %122 : vector<2x8x1xf32> to vector<2x8x8xf32>
    %124 = arith.mulf %119, %123 : vector<2x8x8xf32>
    "tpu.trace_start"() <{level = 10 : i32, message = "bqk,bkd->bqd"}> : () -> ()
    %cst_50 = arith.constant dense<0.000000e+00> : vector<2x8x8xf32>
    %125 = tpu.matmul %124, %109, %cst_50 {dimension_numbers = #tpu.dot_dimension_numbers<[2], [1], [1], [2], [0, 0, 0, 1, 1, 2], [0], [0]>} : vector<2x8x8xf32>, vector<2x8x8xf32>, vector<2x8x8xf32> -> vector<2x8x8xf32>
    "tpu.trace_stop"() : () -> ()
    %126 = vector.shape_cast %125 : vector<2x8x8xf32> to vector<16x8xf32>
    %c0_51 = arith.constant 0 : index
    %c3 = arith.constant 3 : index
    %c0_52 = arith.constant 0 : index
    %c0_53 = arith.constant 0 : index
    %127 = vector.load %arg3[%c0_51, %c3, %c0_52, %c0_53] : memref<2x4x8x32xf32, #tpu.memory_space<vmem>>, vector<1x1x8x32xf32>
    %128 = vector.shape_cast %127 : vector<1x1x8x32xf32> to vector<8x32xf32>
    %cst_54 = arith.constant dense<0.000000e+00> : vector<16x32xf32>
    %129 = tpu.matmul %126, %128, %cst_54 {dimension_numbers = #tpu.dot_dimension_numbers<[1], [0], [0], [1], [0, 0, 1, 1], [], []>} : vector<16x8xf32>, vector<8x32xf32>, vector<16x32xf32> -> vector<16x32xf32>
    %130 = arith.addf %103, %129 : vector<16x32xf32>
    %131 = vector.broadcast %10 : vector<1x32xf32> to vector<16x32xf32>
    %132 = arith.addf %130, %131 : vector<16x32xf32>
    %133 = arith.addf %132, %6 : vector<16x32xf32>
    %cst_55 = arith.constant dense<0.000000e+00> : vector<16xf32>
    %134 = vector.multi_reduction <add>, %133, %cst_55 [1] : vector<16x32xf32> to vector<16xf32>
    %135 = vector.shape_cast %134 : vector<16xf32> to vector<16x1xf32>
    %cst_56 = arith.constant 3.200000e+01 : f32
    %136 = vector.broadcast %cst_56 : f32 to vector<16x1xf32>
    %137 = arith.divf %135, %136 : vector<16x1xf32>
    %138 = vector.broadcast %137 : vector<16x1xf32> to vector<16x32xf32>
    %139 = arith.subf %133, %138 : vector<16x32xf32>
    %140 = arith.mulf %139, %139 : vector<16x32xf32>
    %cst_57 = arith.constant dense<0.000000e+00> : vector<16xf32>
    %141 = vector.multi_reduction <add>, %140, %cst_57 [1] : vector<16x32xf32> to vector<16xf32>
    %142 = vector.shape_cast %141 : vector<16xf32> to vector<16x1xf32>
    %cst_58 = arith.constant 3.200000e+01 : f32
    %143 = vector.broadcast %cst_58 : f32 to vector<16x1xf32>
    %144 = arith.divf %142, %143 : vector<16x1xf32>
    %cst_59 = arith.constant 9.99999996E-13 : f32
    %145 = vector.broadcast %cst_59 : f32 to vector<16x1xf32>
    %146 = arith.addf %144, %145 : vector<16x1xf32>
    %147 = math.rsqrt %146 : vector<16x1xf32>
    %148 = vector.broadcast %147 : vector<16x1xf32> to vector<16x32xf32>
    %149 = arith.mulf %139, %148 : vector<16x32xf32>
    %150 = vector.broadcast %11 : vector<1x32xf32> to vector<16x32xf32>
    %151 = arith.mulf %149, %150 : vector<16x32xf32>
    %152 = vector.broadcast %12 : vector<1x32xf32> to vector<16x32xf32>
    %153 = arith.addf %151, %152 : vector<16x32xf32>
    %c0_60 = arith.constant 0 : index
    %c0_61 = arith.constant 0 : index
    %c0_62 = arith.constant 0 : index
    %154 = vector.load %arg4[%c0_60, %c0_61, %c0_62] : memref<2x32x64xf32, #tpu.memory_space<vmem>>, vector<1x32x64xf32>
    %155 = vector.shape_cast %154 : vector<1x32x64xf32> to vector<32x64xf32>
    %cst_63 = arith.constant dense<0.000000e+00> : vector<16x64xf32>
    %156 = tpu.matmul %153, %155, %cst_63 {dimension_numbers = #tpu.dot_dimension_numbers<[1], [0], [0], [1], [0, 0, 1, 1], [], []>} : vector<16x32xf32>, vector<32x64xf32>, vector<16x64xf32> -> vector<16x64xf32>
    %157 = vector.broadcast %13 : vector<1x64xf32> to vector<16x64xf32>
    %158 = arith.addf %156, %157 : vector<16x64xf32>
    %159 = arith.mulf %158, %158 : vector<16x64xf32>
    %160 = arith.mulf %158, %159 : vector<16x64xf32>
    %cst_64 = arith.constant 4.471500e-02 : f32
    %161 = vector.broadcast %cst_64 : f32 to vector<16x64xf32>
    %162 = arith.mulf %161, %160 : vector<16x64xf32>
    %163 = arith.addf %158, %162 : vector<16x64xf32>
    %cst_65 = arith.constant 0.797884583 : f32
    %164 = vector.broadcast %cst_65 : f32 to vector<16x64xf32>
    %165 = arith.mulf %164, %163 : vector<16x64xf32>
    %166 = math.tanh %165 : vector<16x64xf32>
    %cst_66 = arith.constant 1.000000e+00 : f32
    %167 = vector.broadcast %cst_66 : f32 to vector<16x64xf32>
    %168 = arith.addf %167, %166 : vector<16x64xf32>
    %cst_67 = arith.constant 5.000000e-01 : f32
    %169 = vector.broadcast %cst_67 : f32 to vector<16x64xf32>
    %170 = arith.mulf %169, %168 : vector<16x64xf32>
    %171 = arith.mulf %158, %170 : vector<16x64xf32>
    %c0_68 = arith.constant 0 : index
    %c0_69 = arith.constant 0 : index
    %c0_70 = arith.constant 0 : index
    %172 = vector.load %arg5[%c0_68, %c0_69, %c0_70] : memref<2x64x32xf32, #tpu.memory_space<vmem>>, vector<1x64x32xf32>
    %173 = vector.shape_cast %172 : vector<1x64x32xf32> to vector<64x32xf32>
    %cst_71 = arith.constant dense<0.000000e+00> : vector<16x32xf32>
    %174 = tpu.matmul %171, %173, %cst_71 {dimension_numbers = #tpu.dot_dimension_numbers<[1], [0], [0], [1], [0, 0, 1, 1], [], []>} : vector<16x64xf32>, vector<64x32xf32>, vector<16x32xf32> -> vector<16x32xf32>
    %175 = vector.broadcast %14 : vector<1x32xf32> to vector<16x32xf32>
    %176 = arith.addf %174, %175 : vector<16x32xf32>
    %177 = arith.addf %176, %153 : vector<16x32xf32>
    %cst_72 = arith.constant dense<0.000000e+00> : vector<16xf32>
    %178 = vector.multi_reduction <add>, %177, %cst_72 [1] : vector<16x32xf32> to vector<16xf32>
    %179 = vector.shape_cast %178 : vector<16xf32> to vector<16x1xf32>
    %cst_73 = arith.constant 3.200000e+01 : f32
    %180 = vector.broadcast %cst_73 : f32 to vector<16x1xf32>
    %181 = arith.divf %179, %180 : vector<16x1xf32>
    %182 = vector.broadcast %181 : vector<16x1xf32> to vector<16x32xf32>
    %183 = arith.subf %177, %182 : vector<16x32xf32>
    %184 = arith.mulf %183, %183 : vector<16x32xf32>
    %cst_74 = arith.constant dense<0.000000e+00> : vector<16xf32>
    %185 = vector.multi_reduction <add>, %184, %cst_74 [1] : vector<16x32xf32> to vector<16xf32>
    %186 = vector.shape_cast %185 : vector<16xf32> to vector<16x1xf32>
    %cst_75 = arith.constant 3.200000e+01 : f32
    %187 = vector.broadcast %cst_75 : f32 to vector<16x1xf32>
    %188 = arith.divf %186, %187 : vector<16x1xf32>
    %cst_76 = arith.constant 9.99999996E-13 : f32
    %189 = vector.broadcast %cst_76 : f32 to vector<16x1xf32>
    %190 = arith.addf %188, %189 : vector<16x1xf32>
    %191 = math.rsqrt %190 : vector<16x1xf32>
    %192 = vector.broadcast %191 : vector<16x1xf32> to vector<16x32xf32>
    %193 = arith.mulf %183, %192 : vector<16x32xf32>
    %194 = vector.broadcast %15 : vector<1x32xf32> to vector<16x32xf32>
    %195 = arith.mulf %193, %194 : vector<16x32xf32>
    %196 = vector.broadcast %16 : vector<1x32xf32> to vector<16x32xf32>
    %197 = arith.addf %195, %196 : vector<16x32xf32>
    %cst_77 = arith.constant dense<0.000000e+00> : vector<16x5xf32>
    %198 = tpu.matmul %197, %1, %cst_77 {dimension_numbers = #tpu.dot_dimension_numbers<[1], [0], [0], [1], [0, 0, 1, 1], [], []>} : vector<16x32xf32>, vector<32x5xf32>, vector<16x5xf32> -> vector<16x5xf32>
    %199 = arith.addf %3, %198 : vector<16x5xf32>
    %200 = vector.broadcast %2 : vector<1x5xf32> to vector<16x5xf32>
    %201 = arith.addf %199, %200 : vector<16x5xf32>
    %c1_78 = arith.constant 1 : index
    %c0_79 = arith.constant 0 : index
    %c0_80 = arith.constant 0 : index
    %c0_81 = arith.constant 0 : index
    %202 = vector.load %arg0[%c1_78, %c0_79, %c0_80, %c0_81] : memref<2x2x8x32xf32, #tpu.memory_space<vmem>>, vector<1x2x8x32xf32>
    %203 = vector.shape_cast %202 : vector<1x2x8x32xf32> to vector<2x8x32xf32>
    %204 = vector.shape_cast %203 : vector<2x8x32xf32> to vector<16x32xf32>
    %c1_82 = arith.constant 1 : index
    %c0_83 = arith.constant 0 : index
    %c0_84 = arith.constant 0 : index
    %205 = vector.load %arg6[%c1_82, %c0_83, %c0_84] : memref<2x8x96xf32, #tpu.memory_space<vmem>>, vector<1x8x96xf32>
    %206 = vector.shape_cast %205 : vector<1x8x96xf32> to vector<8x96xf32>
    %207 = vector.extract_strided_slice %206 {offsets = [0, 0], sizes = [1, 96], strides = [1, 1]} : vector<8x96xf32> to vector<1x96xf32>
    %208 = vector.extract_strided_slice %206 {offsets = [1, 0], sizes = [1, 32], strides = [1, 1]} : vector<8x96xf32> to vector<1x32xf32>
    %209 = vector.extract_strided_slice %206 {offsets = [2, 0], sizes = [1, 32], strides = [1, 1]} : vector<8x96xf32> to vector<1x32xf32>
    %210 = vector.extract_strided_slice %206 {offsets = [3, 0], sizes = [1, 32], strides = [1, 1]} : vector<8x96xf32> to vector<1x32xf32>
    %211 = vector.extract_strided_slice %206 {offsets = [4, 0], sizes = [1, 64], strides = [1, 1]} : vector<8x96xf32> to vector<1x64xf32>
    %212 = vector.extract_strided_slice %206 {offsets = [5, 0], sizes = [1, 32], strides = [1, 1]} : vector<8x96xf32> to vector<1x32xf32>
    %213 = vector.extract_strided_slice %206 {offsets = [6, 0], sizes = [1, 32], strides = [1, 1]} : vector<8x96xf32> to vector<1x32xf32>
    %214 = vector.extract_strided_slice %206 {offsets = [7, 0], sizes = [1, 32], strides = [1, 1]} : vector<8x96xf32> to vector<1x32xf32>
    %c1_85 = arith.constant 1 : index
    %c0_86 = arith.constant 0 : index
    %c0_87 = arith.constant 0 : index
    %215 = vector.load %arg2[%c1_85, %c0_86, %c0_87] : memref<2x32x96xf32, #tpu.memory_space<vmem>>, vector<1x32x96xf32>
    %216 = vector.shape_cast %215 : vector<1x32x96xf32> to vector<32x96xf32>
    %cst_88 = arith.constant dense<0.000000e+00> : vector<16x96xf32>
    %217 = tpu.matmul %204, %216, %cst_88 {dimension_numbers = #tpu.dot_dimension_numbers<[1], [0], [0], [1], [0, 0, 1, 1], [], []>} : vector<16x32xf32>, vector<32x96xf32>, vector<16x96xf32> -> vector<16x96xf32>
    %218 = vector.broadcast %207 : vector<1x96xf32> to vector<16x96xf32>
    %219 = arith.addf %217, %218 : vector<16x96xf32>
    %cst_89 = arith.constant 0.000000e+00 : f32
    %220 = vector.broadcast %cst_89 : f32 to vector<16x32xf32>
    %221 = vector.extract_strided_slice %219 {offsets = [0, 0], sizes = [16, 8], strides = [1, 1]} : vector<16x96xf32> to vector<16x8xf32>
    %222 = vector.shape_cast %221 : vector<16x8xf32> to vector<2x8x8xf32>
    %223 = vector.extract_strided_slice %219 {offsets = [0, 32], sizes = [16, 8], strides = [1, 1]} : vector<16x96xf32> to vector<16x8xf32>
    %224 = vector.shape_cast %223 : vector<16x8xf32> to vector<2x8x8xf32>
    %225 = vector.extract_strided_slice %219 {offsets = [0, 64], sizes = [16, 8], strides = [1, 1]} : vector<16x96xf32> to vector<16x8xf32>
    %226 = vector.shape_cast %225 : vector<16x8xf32> to vector<2x8x8xf32>
    "tpu.trace_start"() <{level = 10 : i32, message = "bqd,bkd->bqk"}> : () -> ()
    %cst_90 = arith.constant dense<0.000000e+00> : vector<2x8x8xf32>
    %227 = tpu.matmul %222, %224, %cst_90 {dimension_numbers = #tpu.dot_dimension_numbers<[2], [2], [1], [1], [0, 0, 0, 1, 1, 1], [0], [0]>} : vector<2x8x8xf32>, vector<2x8x8xf32>, vector<2x8x8xf32> -> vector<2x8x8xf32>
    "tpu.trace_stop"() : () -> ()
    %cst_91 = arith.constant 0.353553385 : f32
    %228 = vector.broadcast %cst_91 : f32 to vector<2x8x8xf32>
    %229 = arith.mulf %227, %228 : vector<2x8x8xf32>
    %230 = vector.broadcast %0 : vector<2x1x8xf32> to vector<2x8x8xf32>
    %231 = arith.addf %229, %230 : vector<2x8x8xf32>
    %cst_92 = arith.constant dense<0xFF800000> : vector<2x8xf32>
    %232 = vector.multi_reduction <maximumf>, %231, %cst_92 [2] : vector<2x8x8xf32> to vector<2x8xf32>
    %233 = vector.shape_cast %232 : vector<2x8xf32> to vector<2x8x1xf32>
    %234 = vector.broadcast %233 : vector<2x8x1xf32> to vector<2x8x8xf32>
    %235 = arith.subf %231, %234 : vector<2x8x8xf32>
    %236 = math.exp %235 : vector<2x8x8xf32>
    %cst_93 = arith.constant dense<0.000000e+00> : vector<2x8xf32>
    %237 = vector.multi_reduction <add>, %236, %cst_93 [2] : vector<2x8x8xf32> to vector<2x8xf32>
    %238 = vector.shape_cast %237 : vector<2x8xf32> to vector<2x8x1xf32>
    %239 = tpu.reciprocal %238 {approx = true} : vector<2x8x1xf32> -> vector<2x8x1xf32>
    %240 = vector.broadcast %239 : vector<2x8x1xf32> to vector<2x8x8xf32>
    %241 = arith.mulf %236, %240 : vector<2x8x8xf32>
    "tpu.trace_start"() <{level = 10 : i32, message = "bqk,bkd->bqd"}> : () -> ()
    %cst_94 = arith.constant dense<0.000000e+00> : vector<2x8x8xf32>
    %242 = tpu.matmul %241, %226, %cst_94 {dimension_numbers = #tpu.dot_dimension_numbers<[2], [1], [1], [2], [0, 0, 0, 1, 1, 2], [0], [0]>} : vector<2x8x8xf32>, vector<2x8x8xf32>, vector<2x8x8xf32> -> vector<2x8x8xf32>
    "tpu.trace_stop"() : () -> ()
    %243 = vector.shape_cast %242 : vector<2x8x8xf32> to vector<16x8xf32>
    %c1_95 = arith.constant 1 : index
    %c0_96 = arith.constant 0 : index
    %c0_97 = arith.constant 0 : index
    %c0_98 = arith.constant 0 : index
    %244 = vector.load %arg3[%c1_95, %c0_96, %c0_97, %c0_98] : memref<2x4x8x32xf32, #tpu.memory_space<vmem>>, vector<1x1x8x32xf32>
    %245 = vector.shape_cast %244 : vector<1x1x8x32xf32> to vector<8x32xf32>
    %cst_99 = arith.constant dense<0.000000e+00> : vector<16x32xf32>
    %246 = tpu.matmul %243, %245, %cst_99 {dimension_numbers = #tpu.dot_dimension_numbers<[1], [0], [0], [1], [0, 0, 1, 1], [], []>} : vector<16x8xf32>, vector<8x32xf32>, vector<16x32xf32> -> vector<16x32xf32>
    %247 = arith.addf %220, %246 : vector<16x32xf32>
    %248 = vector.extract_strided_slice %219 {offsets = [0, 8], sizes = [16, 8], strides = [1, 1]} : vector<16x96xf32> to vector<16x8xf32>
    %249 = vector.shape_cast %248 : vector<16x8xf32> to vector<2x8x8xf32>
    %250 = vector.extract_strided_slice %219 {offsets = [0, 40], sizes = [16, 8], strides = [1, 1]} : vector<16x96xf32> to vector<16x8xf32>
    %251 = vector.shape_cast %250 : vector<16x8xf32> to vector<2x8x8xf32>
    %252 = vector.extract_strided_slice %219 {offsets = [0, 72], sizes = [16, 8], strides = [1, 1]} : vector<16x96xf32> to vector<16x8xf32>
    %253 = vector.shape_cast %252 : vector<16x8xf32> to vector<2x8x8xf32>
    "tpu.trace_start"() <{level = 10 : i32, message = "bqd,bkd->bqk"}> : () -> ()
    %cst_100 = arith.constant dense<0.000000e+00> : vector<2x8x8xf32>
    %254 = tpu.matmul %249, %251, %cst_100 {dimension_numbers = #tpu.dot_dimension_numbers<[2], [2], [1], [1], [0, 0, 0, 1, 1, 1], [0], [0]>} : vector<2x8x8xf32>, vector<2x8x8xf32>, vector<2x8x8xf32> -> vector<2x8x8xf32>
    "tpu.trace_stop"() : () -> ()
    %cst_101 = arith.constant 0.353553385 : f32
    %255 = vector.broadcast %cst_101 : f32 to vector<2x8x8xf32>
    %256 = arith.mulf %254, %255 : vector<2x8x8xf32>
    %257 = vector.broadcast %0 : vector<2x1x8xf32> to vector<2x8x8xf32>
    %258 = arith.addf %256, %257 : vector<2x8x8xf32>
    %cst_102 = arith.constant dense<0xFF800000> : vector<2x8xf32>
    %259 = vector.multi_reduction <maximumf>, %258, %cst_102 [2] : vector<2x8x8xf32> to vector<2x8xf32>
    %260 = vector.shape_cast %259 : vector<2x8xf32> to vector<2x8x1xf32>
    %261 = vector.broadcast %260 : vector<2x8x1xf32> to vector<2x8x8xf32>
    %262 = arith.subf %258, %261 : vector<2x8x8xf32>
    %263 = math.exp %262 : vector<2x8x8xf32>
    %cst_103 = arith.constant dense<0.000000e+00> : vector<2x8xf32>
    %264 = vector.multi_reduction <add>, %263, %cst_103 [2] : vector<2x8x8xf32> to vector<2x8xf32>
    %265 = vector.shape_cast %264 : vector<2x8xf32> to vector<2x8x1xf32>
    %266 = tpu.reciprocal %265 {approx = true} : vector<2x8x1xf32> -> vector<2x8x1xf32>
    %267 = vector.broadcast %266 : vector<2x8x1xf32> to vector<2x8x8xf32>
    %268 = arith.mulf %263, %267 : vector<2x8x8xf32>
    "tpu.trace_start"() <{level = 10 : i32, message = "bqk,bkd->bqd"}> : () -> ()
    %cst_104 = arith.constant dense<0.000000e+00> : vector<2x8x8xf32>
    %269 = tpu.matmul %268, %253, %cst_104 {dimension_numbers = #tpu.dot_dimension_numbers<[2], [1], [1], [2], [0, 0, 0, 1, 1, 2], [0], [0]>} : vector<2x8x8xf32>, vector<2x8x8xf32>, vector<2x8x8xf32> -> vector<2x8x8xf32>
    "tpu.trace_stop"() : () -> ()
    %270 = vector.shape_cast %269 : vector<2x8x8xf32> to vector<16x8xf32>
    %c1_105 = arith.constant 1 : index
    %c1_106 = arith.constant 1 : index
    %c0_107 = arith.constant 0 : index
    %c0_108 = arith.constant 0 : index
    %271 = vector.load %arg3[%c1_105, %c1_106, %c0_107, %c0_108] : memref<2x4x8x32xf32, #tpu.memory_space<vmem>>, vector<1x1x8x32xf32>
    %272 = vector.shape_cast %271 : vector<1x1x8x32xf32> to vector<8x32xf32>
    %cst_109 = arith.constant dense<0.000000e+00> : vector<16x32xf32>
    %273 = tpu.matmul %270, %272, %cst_109 {dimension_numbers = #tpu.dot_dimension_numbers<[1], [0], [0], [1], [0, 0, 1, 1], [], []>} : vector<16x8xf32>, vector<8x32xf32>, vector<16x32xf32> -> vector<16x32xf32>
    %274 = arith.addf %247, %273 : vector<16x32xf32>
    %275 = vector.extract_strided_slice %219 {offsets = [0, 16], sizes = [16, 8], strides = [1, 1]} : vector<16x96xf32> to vector<16x8xf32>
    %276 = vector.shape_cast %275 : vector<16x8xf32> to vector<2x8x8xf32>
    %277 = vector.extract_strided_slice %219 {offsets = [0, 48], sizes = [16, 8], strides = [1, 1]} : vector<16x96xf32> to vector<16x8xf32>
    %278 = vector.shape_cast %277 : vector<16x8xf32> to vector<2x8x8xf32>
    %279 = vector.extract_strided_slice %219 {offsets = [0, 80], sizes = [16, 8], strides = [1, 1]} : vector<16x96xf32> to vector<16x8xf32>
    %280 = vector.shape_cast %279 : vector<16x8xf32> to vector<2x8x8xf32>
    "tpu.trace_start"() <{level = 10 : i32, message = "bqd,bkd->bqk"}> : () -> ()
    %cst_110 = arith.constant dense<0.000000e+00> : vector<2x8x8xf32>
    %281 = tpu.matmul %276, %278, %cst_110 {dimension_numbers = #tpu.dot_dimension_numbers<[2], [2], [1], [1], [0, 0, 0, 1, 1, 1], [0], [0]>} : vector<2x8x8xf32>, vector<2x8x8xf32>, vector<2x8x8xf32> -> vector<2x8x8xf32>
    "tpu.trace_stop"() : () -> ()
    %cst_111 = arith.constant 0.353553385 : f32
    %282 = vector.broadcast %cst_111 : f32 to vector<2x8x8xf32>
    %283 = arith.mulf %281, %282 : vector<2x8x8xf32>
    %284 = vector.broadcast %0 : vector<2x1x8xf32> to vector<2x8x8xf32>
    %285 = arith.addf %283, %284 : vector<2x8x8xf32>
    %cst_112 = arith.constant dense<0xFF800000> : vector<2x8xf32>
    %286 = vector.multi_reduction <maximumf>, %285, %cst_112 [2] : vector<2x8x8xf32> to vector<2x8xf32>
    %287 = vector.shape_cast %286 : vector<2x8xf32> to vector<2x8x1xf32>
    %288 = vector.broadcast %287 : vector<2x8x1xf32> to vector<2x8x8xf32>
    %289 = arith.subf %285, %288 : vector<2x8x8xf32>
    %290 = math.exp %289 : vector<2x8x8xf32>
    %cst_113 = arith.constant dense<0.000000e+00> : vector<2x8xf32>
    %291 = vector.multi_reduction <add>, %290, %cst_113 [2] : vector<2x8x8xf32> to vector<2x8xf32>
    %292 = vector.shape_cast %291 : vector<2x8xf32> to vector<2x8x1xf32>
    %293 = tpu.reciprocal %292 {approx = true} : vector<2x8x1xf32> -> vector<2x8x1xf32>
    %294 = vector.broadcast %293 : vector<2x8x1xf32> to vector<2x8x8xf32>
    %295 = arith.mulf %290, %294 : vector<2x8x8xf32>
    "tpu.trace_start"() <{level = 10 : i32, message = "bqk,bkd->bqd"}> : () -> ()
    %cst_114 = arith.constant dense<0.000000e+00> : vector<2x8x8xf32>
    %296 = tpu.matmul %295, %280, %cst_114 {dimension_numbers = #tpu.dot_dimension_numbers<[2], [1], [1], [2], [0, 0, 0, 1, 1, 2], [0], [0]>} : vector<2x8x8xf32>, vector<2x8x8xf32>, vector<2x8x8xf32> -> vector<2x8x8xf32>
    "tpu.trace_stop"() : () -> ()
    %297 = vector.shape_cast %296 : vector<2x8x8xf32> to vector<16x8xf32>
    %c1_115 = arith.constant 1 : index
    %c2_116 = arith.constant 2 : index
    %c0_117 = arith.constant 0 : index
    %c0_118 = arith.constant 0 : index
    %298 = vector.load %arg3[%c1_115, %c2_116, %c0_117, %c0_118] : memref<2x4x8x32xf32, #tpu.memory_space<vmem>>, vector<1x1x8x32xf32>
    %299 = vector.shape_cast %298 : vector<1x1x8x32xf32> to vector<8x32xf32>
    %cst_119 = arith.constant dense<0.000000e+00> : vector<16x32xf32>
    %300 = tpu.matmul %297, %299, %cst_119 {dimension_numbers = #tpu.dot_dimension_numbers<[1], [0], [0], [1], [0, 0, 1, 1], [], []>} : vector<16x8xf32>, vector<8x32xf32>, vector<16x32xf32> -> vector<16x32xf32>
    %301 = arith.addf %274, %300 : vector<16x32xf32>
    %302 = vector.extract_strided_slice %219 {offsets = [0, 24], sizes = [16, 8], strides = [1, 1]} : vector<16x96xf32> to vector<16x8xf32>
    %303 = vector.shape_cast %302 : vector<16x8xf32> to vector<2x8x8xf32>
    %304 = vector.extract_strided_slice %219 {offsets = [0, 56], sizes = [16, 8], strides = [1, 1]} : vector<16x96xf32> to vector<16x8xf32>
    %305 = vector.shape_cast %304 : vector<16x8xf32> to vector<2x8x8xf32>
    %306 = vector.extract_strided_slice %219 {offsets = [0, 88], sizes = [16, 8], strides = [1, 1]} : vector<16x96xf32> to vector<16x8xf32>
    %307 = vector.shape_cast %306 : vector<16x8xf32> to vector<2x8x8xf32>
    "tpu.trace_start"() <{level = 10 : i32, message = "bqd,bkd->bqk"}> : () -> ()
    %cst_120 = arith.constant dense<0.000000e+00> : vector<2x8x8xf32>
    %308 = tpu.matmul %303, %305, %cst_120 {dimension_numbers = #tpu.dot_dimension_numbers<[2], [2], [1], [1], [0, 0, 0, 1, 1, 1], [0], [0]>} : vector<2x8x8xf32>, vector<2x8x8xf32>, vector<2x8x8xf32> -> vector<2x8x8xf32>
    "tpu.trace_stop"() : () -> ()
    %cst_121 = arith.constant 0.353553385 : f32
    %309 = vector.broadcast %cst_121 : f32 to vector<2x8x8xf32>
    %310 = arith.mulf %308, %309 : vector<2x8x8xf32>
    %311 = vector.broadcast %0 : vector<2x1x8xf32> to vector<2x8x8xf32>
    %312 = arith.addf %310, %311 : vector<2x8x8xf32>
    %cst_122 = arith.constant dense<0xFF800000> : vector<2x8xf32>
    %313 = vector.multi_reduction <maximumf>, %312, %cst_122 [2] : vector<2x8x8xf32> to vector<2x8xf32>
    %314 = vector.shape_cast %313 : vector<2x8xf32> to vector<2x8x1xf32>
    %315 = vector.broadcast %314 : vector<2x8x1xf32> to vector<2x8x8xf32>
    %316 = arith.subf %312, %315 : vector<2x8x8xf32>
    %317 = math.exp %316 : vector<2x8x8xf32>
    %cst_123 = arith.constant dense<0.000000e+00> : vector<2x8xf32>
    %318 = vector.multi_reduction <add>, %317, %cst_123 [2] : vector<2x8x8xf32> to vector<2x8xf32>
    %319 = vector.shape_cast %318 : vector<2x8xf32> to vector<2x8x1xf32>
    %320 = tpu.reciprocal %319 {approx = true} : vector<2x8x1xf32> -> vector<2x8x1xf32>
    %321 = vector.broadcast %320 : vector<2x8x1xf32> to vector<2x8x8xf32>
    %322 = arith.mulf %317, %321 : vector<2x8x8xf32>
    "tpu.trace_start"() <{level = 10 : i32, message = "bqk,bkd->bqd"}> : () -> ()
    %cst_124 = arith.constant dense<0.000000e+00> : vector<2x8x8xf32>
    %323 = tpu.matmul %322, %307, %cst_124 {dimension_numbers = #tpu.dot_dimension_numbers<[2], [1], [1], [2], [0, 0, 0, 1, 1, 2], [0], [0]>} : vector<2x8x8xf32>, vector<2x8x8xf32>, vector<2x8x8xf32> -> vector<2x8x8xf32>
    "tpu.trace_stop"() : () -> ()
    %324 = vector.shape_cast %323 : vector<2x8x8xf32> to vector<16x8xf32>
    %c1_125 = arith.constant 1 : index
    %c3_126 = arith.constant 3 : index
    %c0_127 = arith.constant 0 : index
    %c0_128 = arith.constant 0 : index
    %325 = vector.load %arg3[%c1_125, %c3_126, %c0_127, %c0_128] : memref<2x4x8x32xf32, #tpu.memory_space<vmem>>, vector<1x1x8x32xf32>
    %326 = vector.shape_cast %325 : vector<1x1x8x32xf32> to vector<8x32xf32>
    %cst_129 = arith.constant dense<0.000000e+00> : vector<16x32xf32>
    %327 = tpu.matmul %324, %326, %cst_129 {dimension_numbers = #tpu.dot_dimension_numbers<[1], [0], [0], [1], [0, 0, 1, 1], [], []>} : vector<16x8xf32>, vector<8x32xf32>, vector<16x32xf32> -> vector<16x32xf32>
    %328 = arith.addf %301, %327 : vector<16x32xf32>
    %329 = vector.broadcast %208 : vector<1x32xf32> to vector<16x32xf32>
    %330 = arith.addf %328, %329 : vector<16x32xf32>
    %331 = arith.addf %330, %204 : vector<16x32xf32>
    %cst_130 = arith.constant dense<0.000000e+00> : vector<16xf32>
    %332 = vector.multi_reduction <add>, %331, %cst_130 [1] : vector<16x32xf32> to vector<16xf32>
    %333 = vector.shape_cast %332 : vector<16xf32> to vector<16x1xf32>
    %cst_131 = arith.constant 3.200000e+01 : f32
    %334 = vector.broadcast %cst_131 : f32 to vector<16x1xf32>
    %335 = arith.divf %333, %334 : vector<16x1xf32>
    %336 = vector.broadcast %335 : vector<16x1xf32> to vector<16x32xf32>
    %337 = arith.subf %331, %336 : vector<16x32xf32>
    %338 = arith.mulf %337, %337 : vector<16x32xf32>
    %cst_132 = arith.constant dense<0.000000e+00> : vector<16xf32>
    %339 = vector.multi_reduction <add>, %338, %cst_132 [1] : vector<16x32xf32> to vector<16xf32>
    %340 = vector.shape_cast %339 : vector<16xf32> to vector<16x1xf32>
    %cst_133 = arith.constant 3.200000e+01 : f32
    %341 = vector.broadcast %cst_133 : f32 to vector<16x1xf32>
    %342 = arith.divf %340, %341 : vector<16x1xf32>
    %cst_134 = arith.constant 9.99999996E-13 : f32
    %343 = vector.broadcast %cst_134 : f32 to vector<16x1xf32>
    %344 = arith.addf %342, %343 : vector<16x1xf32>
    %345 = math.rsqrt %344 : vector<16x1xf32>
    %346 = vector.broadcast %345 : vector<16x1xf32> to vector<16x32xf32>
    %347 = arith.mulf %337, %346 : vector<16x32xf32>
    %348 = vector.broadcast %209 : vector<1x32xf32> to vector<16x32xf32>
    %349 = arith.mulf %347, %348 : vector<16x32xf32>
    %350 = vector.broadcast %210 : vector<1x32xf32> to vector<16x32xf32>
    %351 = arith.addf %349, %350 : vector<16x32xf32>
    %c1_135 = arith.constant 1 : index
    %c0_136 = arith.constant 0 : index
    %c0_137 = arith.constant 0 : index
    %352 = vector.load %arg4[%c1_135, %c0_136, %c0_137] : memref<2x32x64xf32, #tpu.memory_space<vmem>>, vector<1x32x64xf32>
    %353 = vector.shape_cast %352 : vector<1x32x64xf32> to vector<32x64xf32>
    %cst_138 = arith.constant dense<0.000000e+00> : vector<16x64xf32>
    %354 = tpu.matmul %351, %353, %cst_138 {dimension_numbers = #tpu.dot_dimension_numbers<[1], [0], [0], [1], [0, 0, 1, 1], [], []>} : vector<16x32xf32>, vector<32x64xf32>, vector<16x64xf32> -> vector<16x64xf32>
    %355 = vector.broadcast %211 : vector<1x64xf32> to vector<16x64xf32>
    %356 = arith.addf %354, %355 : vector<16x64xf32>
    %357 = arith.mulf %356, %356 : vector<16x64xf32>
    %358 = arith.mulf %356, %357 : vector<16x64xf32>
    %cst_139 = arith.constant 4.471500e-02 : f32
    %359 = vector.broadcast %cst_139 : f32 to vector<16x64xf32>
    %360 = arith.mulf %359, %358 : vector<16x64xf32>
    %361 = arith.addf %356, %360 : vector<16x64xf32>
    %cst_140 = arith.constant 0.797884583 : f32
    %362 = vector.broadcast %cst_140 : f32 to vector<16x64xf32>
    %363 = arith.mulf %362, %361 : vector<16x64xf32>
    %364 = math.tanh %363 : vector<16x64xf32>
    %cst_141 = arith.constant 1.000000e+00 : f32
    %365 = vector.broadcast %cst_141 : f32 to vector<16x64xf32>
    %366 = arith.addf %365, %364 : vector<16x64xf32>
    %cst_142 = arith.constant 5.000000e-01 : f32
    %367 = vector.broadcast %cst_142 : f32 to vector<16x64xf32>
    %368 = arith.mulf %367, %366 : vector<16x64xf32>
    %369 = arith.mulf %356, %368 : vector<16x64xf32>
    %c1_143 = arith.constant 1 : index
    %c0_144 = arith.constant 0 : index
    %c0_145 = arith.constant 0 : index
    %370 = vector.load %arg5[%c1_143, %c0_144, %c0_145] : memref<2x64x32xf32, #tpu.memory_space<vmem>>, vector<1x64x32xf32>
    %371 = vector.shape_cast %370 : vector<1x64x32xf32> to vector<64x32xf32>
    %cst_146 = arith.constant dense<0.000000e+00> : vector<16x32xf32>
    %372 = tpu.matmul %369, %371, %cst_146 {dimension_numbers = #tpu.dot_dimension_numbers<[1], [0], [0], [1], [0, 0, 1, 1], [], []>} : vector<16x64xf32>, vector<64x32xf32>, vector<16x32xf32> -> vector<16x32xf32>
    %373 = vector.broadcast %212 : vector<1x32xf32> to vector<16x32xf32>
    %374 = arith.addf %372, %373 : vector<16x32xf32>
    %375 = arith.addf %374, %351 : vector<16x32xf32>
    %cst_147 = arith.constant dense<0.000000e+00> : vector<16xf32>
    %376 = vector.multi_reduction <add>, %375, %cst_147 [1] : vector<16x32xf32> to vector<16xf32>
    %377 = vector.shape_cast %376 : vector<16xf32> to vector<16x1xf32>
    %cst_148 = arith.constant 3.200000e+01 : f32
    %378 = vector.broadcast %cst_148 : f32 to vector<16x1xf32>
    %379 = arith.divf %377, %378 : vector<16x1xf32>
    %380 = vector.broadcast %379 : vector<16x1xf32> to vector<16x32xf32>
    %381 = arith.subf %375, %380 : vector<16x32xf32>
    %382 = arith.mulf %381, %381 : vector<16x32xf32>
    %cst_149 = arith.constant dense<0.000000e+00> : vector<16xf32>
    %383 = vector.multi_reduction <add>, %382, %cst_149 [1] : vector<16x32xf32> to vector<16xf32>
    %384 = vector.shape_cast %383 : vector<16xf32> to vector<16x1xf32>
    %cst_150 = arith.constant 3.200000e+01 : f32
    %385 = vector.broadcast %cst_150 : f32 to vector<16x1xf32>
    %386 = arith.divf %384, %385 : vector<16x1xf32>
    %cst_151 = arith.constant 9.99999996E-13 : f32
    %387 = vector.broadcast %cst_151 : f32 to vector<16x1xf32>
    %388 = arith.addf %386, %387 : vector<16x1xf32>
    %389 = math.rsqrt %388 : vector<16x1xf32>
    %390 = vector.broadcast %389 : vector<16x1xf32> to vector<16x32xf32>
    %391 = arith.mulf %381, %390 : vector<16x32xf32>
    %392 = vector.broadcast %213 : vector<1x32xf32> to vector<16x32xf32>
    %393 = arith.mulf %391, %392 : vector<16x32xf32>
    %394 = vector.broadcast %214 : vector<1x32xf32> to vector<16x32xf32>
    %395 = arith.addf %393, %394 : vector<16x32xf32>
    %cst_152 = arith.constant dense<0.000000e+00> : vector<16x5xf32>
    %396 = tpu.matmul %395, %1, %cst_152 {dimension_numbers = #tpu.dot_dimension_numbers<[1], [0], [0], [1], [0, 0, 1, 1], [], []>} : vector<16x32xf32>, vector<32x5xf32>, vector<16x5xf32> -> vector<16x5xf32>
    %397 = arith.addf %201, %396 : vector<16x5xf32>
    %398 = vector.broadcast %2 : vector<1x5xf32> to vector<16x5xf32>
    %399 = arith.addf %397, %398 : vector<16x5xf32>
    %cst_153 = arith.constant 5.000000e-01 : f32
    %400 = vector.broadcast %cst_153 : f32 to vector<16x5xf32>
    %401 = arith.mulf %399, %400 : vector<16x5xf32>
    %c0_154 = arith.constant 0 : index
    %c0_155 = arith.constant 0 : index
    %402 = vector.load %arg9[%c0_154, %c0_155] : memref<16x5xf32, #tpu.memory_space<vmem>>, vector<16x5xf32>
    tpu.vector_store %arg9[%c0_154, %c0_155], %401 {strides = array<i32>} : memref<16x5xf32, #tpu.memory_space<vmem>>, vector<16x5xf32>,
    return
  }
}

</mosaic_0001>

<bundles_post_ra>
// kernel: tpu_custom_call.1
= control target key start
LH: loop header
LB: loop body
LE: loop exit
PB: predicated region body
PF: predicated region fallthrough
CT: control target
= control target key end

     0   :  { %vm50_vm0 = vcmask 261120   ;;  %v5092_v8 = vmov 0.0   ;;  %v46_v9 = vlaneseq  ;;  %vm5093_vm1 = vmmov 0   ;;  %s5094_s23 = smov 96   ;;  %s5095_s28 = smov 64   ;;  %s5780_s2 = inlined_call_operand.vmem [shape: f32[2,32,96], index: 2, kind: input, shape index: {}]   ;;  %s5781_s0 = inlined_call_operand.vmem [shape: f32[2,2,8,32], index: 0, kind: input, shape index: {}]   ;;  %s5782_s6 = inlined_call_operand.vmem [shape: f32[2,8,96], index: 6, kind: input, shape index: {}]   ;;  %s5783_s1 = inlined_call_operand.vmem [shape: f32[2,1,8], index: 1, kind: input, shape index: {}]   ;;  %s5784_s3 = inlined_call_operand.vmem [shape: f32[2,4,8,32], index: 3, kind: input, shape index: {}]   ;;  %s5785_s4 = inlined_call_operand.vmem [shape: f32[2,32,64], index: 4, kind: input, shape index: {}]   ;;  %s5786_s5 = inlined_call_operand.vmem [shape: f32[2,64,32], index: 5, kind: input, shape index: {}]   ;;  %s5787_s7 = inlined_call_operand.vmem [shape: f32[32,5], index: 7, kind: input, shape index: {}]   ;;  %s5788_s8 = inlined_call_operand.vmem [shape: f32[1,5], index: 8, kind: input, shape index: {}]   ;;  %s5789_s9 = inlined_call_operand.vmem [shape: f32[16,5], index: 9, kind: output, shape index: {}]  }
   0x1   :  { %v42_v0 = vld [vmem:[%s5780_s2] sm:$0xff]  ;;  %v43_v1 = vld [vmem:[%s5780_s2 + $0x8] sm:$0xff]  ;;  %v44_v2 = vld [vmem:[%s5780_s2 + $0x10] sm:$0xff]  ;;  %4600 = vmatprep.subr.mxu1 %v5092_v8  ;;  %4602 = vmatprep.mubr.msk.f32.mxu1 %vm5093_vm1, %v5092_v8  ;;  %vm135_vm2 = vcmask 64512   ;;  %s5096_s29 = smov 88   ;;  %s5097_s30 = smov 120  }
   0x2   :  { %v4893_v3 = vpack.c.bf16 %v43_v1, %v42_v0  ;;  %v45_v4 = vld [vmem:[%s5780_s2 + $0x18] sm:$0xff]  ;;  %v5170_v5 = vld [vmem:[%s5781_s0] sm:$0xff]  ;;  %v5177_v7 = vld [vmem:[%s5781_s0 + $0x8] sm:$0xff]  ;;  %v5183_v10 = vshrl.u32 %v46_v9, 7  ;;  %s5098_s10 = smov 56   ;;  %s5099_s11 = smov 112  }
   0x3   :  { %v4897_v6 = vpack.c.bf16 %v45_v4, %v44_v2  ;;  %4597 = vmatprep.mubr.msk.f32.mxu0 %vm50_vm0, %v5170_v5  ;;  %v5193_v12 = vld [vmem:[%s5782_s6] sm:$0xff]  ;;  %s5100_s12 = smov 80   ;;  %s5101_s13 = smov 48   ;;  %vm1980_vm3 = vcmask 523264   ;;  %vm4329_vm4 = vcmask 39936  }
   0x4   :  { %4894 = vmatprep.subr.bf16.mxu0 %v4893_v3  ;;  %v48_v11 = vsub.s32 0, %v5183_v10  ;;  %v5221_v21 = vld [vmem:[%s5783_s1] ss:$0 sm:$0xff]  ;;  %v5227_v26 = vld [vmem:[%s5783_s1 + $0x1] ss:$0 sm:$0xff]  ;;  %s5102_s14 = smov 72  }
   0x5   :  { %4896 = vmatpush3.bf16.msra.mxu0 %v4893_v3  ;;  %s5103_s15 = smov 104   ;;  %s5104_s22 = smov 40  }
   0x6   :  { %4898 = vmatprep.subr.bf16.mxu0 %v4897_v6  ;;  %v49_v13 = vrot.slane %v5193_v12, %v48_v11 }
   0x9   :  { %4900 = vmatpush3.bf16.msra.mxu0 %v4897_v6 }
   0xa   :  { %4620 = vmatprep.subr.mxu0 %v5092_v8 }
   0xc   :  { %4598 = vmatmul.mubr.msk.f32.vlgmr.msra.gmra.mrb[0].mxu0 %vm50_vm0, %v5177_v7 }
   0xd   :  { %4622 = vmatprep.mubr.msk.f32.mxu0 %vm5093_vm1, %v5092_v8 }
  0xdf   :  { %v4599_v14 = vpop.f32.mrb[0].mxu0 }
  0xe0   :  { %v123_v15 = vpop.f32.mrb[1].mxu0  ;;  %v5202_v17 = vadd.f32 %v4599_v14, %v49_v13 }
  0xe1   :  { %v5198_v16 = vadd.f32 %v123_v15, %v49_v13 }
  0xe3   :  { %133 = vrot.lane.b32.xlu0 %v5198_v16, %s5094_s23 }
  0xe7   :  { %211 = vrot.lane.b32.xlu0 %v5202_v17, %s5094_s23 }
 0x155   :  { %v134_v18 = vpop.permute.xlu0 %133 }
 0x156   :  { %4601 = vmatpush3.xpose.msk.msra.mxu1 %vm135_vm2, %v134_v18 }
 0x157   :  { %4605 = vmatprep.subr.mxu1 %v5092_v8 }
 0x159   :  { %4603 = vmatmul.mubr.msk.f32.vlgmr.msra.gmra.mrb[0].mxu1 %vm135_vm2, %v5198_v16  ;;  %v212_v19 = vpop.permute.xlu0 %211 }
 0x15a   :  { %4606 = vmatpush3.xpose.msk.msra.mxu1 %vm135_vm2, %v212_v19  ;;  %4607 = vmatprep.mubr.msk.f32.mxu1 %vm5093_vm1, %v5092_v8 }
 0x15b   :  { %4610 = vmatprep.subr.mxu1 %v5092_v8 }
 0x15d   :  { %4608 = vmatmul.mubr.msk.f32.vlgmr.msra.gmra.mrb[2].mxu1 %vm135_vm2, %v5202_v17 }
 0x15e   :  { %4612 = vmatprep.mubr.msk.f32.mxu1 %vm5093_vm1, %v5092_v8 }
 0x22c   :  { %v206_v20 = vpop.f32.mrb[0].mxu1 }
 0x22d   :  { %v287_v22 = vmul.f32 0.35355338, %v206_v20  ;;  %v4604_v23 = vpop.f32.mrb[1].mxu1 }
 0x22f   :  { %v301_v24 = vadd.f32 %v5221_v21, %v287_v22 }
 0x230   :  { %v283_v25 = vpop.f32.mrb[2].mxu1 }
 0x231   :  { %v288_v27 = vmul.f32 0.35355338, %v283_v25  ;;  %v4609_v28 = vpop.f32.mrb[3].mxu1  ;;  %v303_v29 = vsel %vm135_vm2, %v301_v24, -inf }
 0x232   :  { %304 = vmax.xlane.f32.xlu1 %v303_v29 }
 0x233   :  { %v302_v30 = vadd.f32 %v5227_v26, %v288_v27 }
 0x235   :  { %v306_v31 = vsel %vm135_vm2, %v302_v30, -inf }
 0x236   :  { %307 = vmax.xlane.f32.xlu1 %v306_v31 }
 0x247   :  { %325 = vrot.lane.b32.xlu1 %v5198_v16, %s5095_s28 }
 0x24b   :  { %401 = vrot.lane.b32.xlu1 %v5202_v17, %s5095_s28 }
 0x24f   :  { %558 = vrot.lane.b32.xlu1 %v5202_v17, %s5096_s29 }
 0x2bf   :  { %v305_v32 = vpop.xlane.xlu1 %304 }
 0x2c0   :  { %v309_v33 = vsub.f32 %v301_v24, %v305_v32 }
 0x2c2   :  { %v311_v34 = vmul.f32 1.442695, %v309_v33 }
 0x2c3   :  { %v308_v35 = vpop.xlane.xlu1 %307 }
 0x2c4   :  { %5002 = vpow2.f32 %v311_v34  ;;  %v310_v36 = vsub.f32 %v302_v30, %v308_v35 }
 0x2c6   :  { %v313_v37 = vmul.f32 1.442695, %v310_v36 }
 0x2c7   :  { %v326_v38 = vpop.permute.xlu1 %325 }
 0x2c8   :  { %5004 = vpow2.f32 %v313_v37  ;;  %4611 = vmatpush3.msra.mxu1 %v326_v38  ;;  %v4352_v37 = vld [vmem:[%s5784_s3 + $0x8] sm:$0xff]  ;;  %v477_v38 = vld [vmem:[%s5784_s3] sm:$0xff] }
 0x2c9   :  { %4615 = vmatprep.subr.mxu1 %v5092_v8 }
 0x2cb   :  { %v402_v43 = vpop.permute.xlu1 %401 }
 0x2ce   :  { %v5003_v39 = vpop.eup %5002 }
 0x2cf   :  { %v315_v40 = vsel %vm135_vm2, %v5003_v39, 0.0  ;;  %v559_v44 = vpop.permute.xlu1 %558 }
 0x2d0   :  { %316 = vadd.xlane.f32.xlu0 %v315_v40 }
 0x2d2   :  { %v5005_v41 = vpop.eup %5004 }
 0x2d3   :  { %v318_v42 = vsel %vm135_vm2, %v5005_v41, 0.0 }
 0x2d4   :  { %319 = vadd.xlane.f32.xlu1 %v318_v42 }
 0x2e5   :  { %556 = vrot.lane.b32.xlu1 %v5202_v17, %s5097_s30 }
 0x2e6   :  { %480 = vrot.lane.b32.xlu0 %v5198_v16, %s5096_s29 }
 0x2e9   :  { %478 = vrot.lane.b32.xlu1 %v5198_v16, %s5097_s30 }
 0x35d   :  { %v317_v45 = vpop.xlane.xlu0 %316 }
 0x35e   :  { %5006 = vrcp.f32 %v317_v45 }
 0x361   :  { %v320_v46 = vpop.xlane.xlu1 %319  ;;  %v481_v47 = vpop.permute.xlu0 %480 }
 0x362   :  { %5008 = vrcp.f32 %v320_v46  ;;  %4621 = vmatpush3.xpose.msk.msra.mxu0 %vm135_vm2, %v481_v47 }
 0x363   :  { %4630 = vmatprep.subr.mxu0 %v5092_v8 }
 0x365   :  { %v557_v48 = vpop.permute.xlu1 %556 }
 0x368   :  { %v5007_v49 = vpop.eup %5006 }
 0x369   :  { %v323_v50 = vmul.f32 %v5007_v49, %v5003_v39  ;;  %v479_v51 = vpop.permute.xlu1 %478 }
 0x36a   :  { %4623 = vmatmul.mubr.msk.f32.vlgmr.msra.gmra.mrb[2].mxu0 %vm135_vm2, %v479_v51 }
 0x36b   :  { %4613 = vmatmul.mubr.msk.f32.vlgmr.msra.gmra.mrb[4].mxu1 %vm135_vm2, %v323_v50  ;;  %4632 = vmatprep.mubr.msk.f32.mxu0 %vm5093_vm1, %v5092_v8 }
 0x36c   :  { %v5009_v52 = vpop.eup %5008  ;;  %4616 = vmatpush3.msra.mxu1 %v402_v43  ;;  %4617 = vmatprep.mubr.msk.f32.mxu1 %vm5093_vm1, %v5092_v8 }
 0x36d   :  { %v324_v53 = vmul.f32 %v5009_v52, %v5005_v41  ;;  %4625 = vmatprep.subr.mxu1 %v5092_v8 }
 0x36f   :  { %4618 = vmatmul.mubr.msk.f32.vlgmr.msra.gmra.mrb[6].mxu1 %vm135_vm2, %v324_v53 }
 0x370   :  { %4627 = vmatprep.mubr.msk.f32.mxu1 %vm5093_vm1, %v5092_v8 }
 0x373   :  { %4626 = vmatpush3.xpose.msk.msra.mxu1 %vm135_vm2, %v559_v44 }
 0x374   :  { %4635 = vmatprep.subr.mxu1 %v5092_v8 }
 0x376   :  { %4628 = vmatmul.mubr.msk.f32.vlgmr.msra.gmra.mrb[8].mxu1 %vm135_vm2, %v557_v48 }
 0x377   :  { %4637 = vmatprep.mubr.msk.f32.mxu1 %vm5093_vm1, %v5092_v8 }
 0x43d   :  { %v552_v54 = vpop.f32.mrb[2].mxu0 }
 0x43e   :  { %v5264_v55 = vpop.f32.mrb[4].mxu1  ;;  %v4624_v56 = vpop.f32.mrb[3].mxu0  ;;  %v634_v1 = vmul.f32 0.35355338, %v552_v54 }
 0x43f   :  { %v4614_v57 = vpop.f32.mrb[5].mxu1 }
 0x440   :  { %v636_v2 = vadd.f32 %v5221_v21, %v634_v1  ;;  %v4363_v1 = vld [vmem:[%s5784_s3 + $0x10] sm:$0xff] }
 0x442   :  { %v5266_v58 = vpop.f32.mrb[6].mxu1  ;;  %v638_v3 = vsel %vm135_vm2, %v636_v2, -inf }
 0x443   :  { %v4619_v59 = vpop.f32.mrb[7].mxu1 }
 0x449   :  { %v630_v60 = vpop.f32.mrb[8].mxu1 }
 0x44a   :  { %v635_v61 = vmul.f32 0.35355338, %v630_v60  ;;  %v4629_v62 = vpop.f32.mrb[9].mxu1 }
 0x44c   :  { %v637_v63 = vadd.f32 %v5227_v26, %v635_v61 }
 0x44e   :  { %v641_v0 = vsel %vm135_vm2, %v637_v63, -inf }
 0x44f   :  { %642 = vmax.xlane.f32.xlu1 %v641_v0 }
 0x460   :  { %736 = vrot.lane.b32.xlu1 %v5202_v17, %s5098_s10 }
 0x464   :  { %976 = vrot.lane.b32.xlu1 %v5198_v16, %s5099_s11 }
 0x468   :  { %1056 = vrot.lane.b32.xlu1 %v5202_v17, %s5100_s12 }
 0x46c   :  { %1054 = vrot.lane.b32.xlu1 %v5202_v17, %s5099_s11 }
 0x490   :  { %639 = vmax.xlane.f32.xlu1 %v638_v3 }
 0x4dc   :  { %v643_v4 = vpop.xlane.xlu1 %642 }
 0x4dd   :  { %v645_v6 = vsub.f32 %v637_v63, %v643_v4 }
 0x4df   :  { %v648_v9 = vmul.f32 1.442695, %v645_v6 }
 0x4e0   :  { %v737_v13 = vpop.permute.xlu1 %736 }
 0x4e1   :  { %5010 = vpow2.f32 %v648_v9  ;;  %4636 = vmatpush3.msra.mxu1 %v737_v13 }
 0x4e2   :  { %4650 = vmatprep.subr.mxu1 %v5092_v8 }
 0x4e4   :  { %v977_v18 = vpop.permute.xlu1 %976 }
 0x4e8   :  { %v1057_v19 = vpop.permute.xlu1 %1056 }
 0x4eb   :  { %v5011_v14 = vpop.eup %5010 }
 0x4ec   :  { %v653_v15 = vsel %vm135_vm2, %v5011_v14, 0.0  ;;  %v1055_v20 = vpop.permute.xlu1 %1054 }
 0x4ed   :  { %654 = vadd.xlane.f32.xlu0 %v653_v15 }
 0x503   :  { %978 = vrot.lane.b32.xlu0 %v5198_v16, %s5100_s12 }
 0x51d   :  { %v640_v22 = vpop.xlane.xlu1 %639 }
 0x51e   :  { %v644_v23 = vsub.f32 %v636_v2, %v640_v22 }
 0x520   :  { %v646_v24 = vmul.f32 1.442695, %v644_v23 }
 0x522   :  { %5012 = vpow2.f32 %v646_v24 }
 0x52c   :  { %v5013_v25 = vpop.eup %5012 }
 0x52d   :  { %v650_v27 = vsel %vm135_vm2, %v5013_v25, 0.0 }
 0x52e   :  { %651 = vadd.xlane.f32.xlu0 %v650_v27 }
 0x544   :  { %660 = vrot.lane.b32.xlu0 %v5198_v16, %s5098_s10 }
 0x548   :  { %1234 = vrot.lane.b32.xlu0 %v5202_v17, %s5101_s13 }
 0x54c   :  { %1397 = vrot.lane.b32.xlu0 %v5198_v16, %s5102_s14 }
 0x550   :  { %1475 = vrot.lane.b32.xlu0 %v5202_v17, %s5102_s14 }
 0x554   :  { %1395 = vrot.lane.b32.xlu0 %v5198_v16, %s5103_s15 }
 0x57a   :  { %v655_v28 = vpop.xlane.xlu0 %654 }
 0x57b   :  { %5014 = vrcp.f32 %v655_v28 }
 0x57e   :  { %v979_v31 = vpop.permute.xlu0 %978 }
 0x585   :  { %v5015_v29 = vpop.eup %5014 }
 0x586   :  { %v659_v30 = vmul.f32 %v5015_v29, %v5011_v14 }
 0x588   :  { %4638 = vmatmul.mubr.msk.f32.vlgmr.msra.gmra.mrb[10].mxu1 %vm135_vm2, %v659_v30 }
 0x589   :  { %4651 = vmatpush3.xpose.msk.msra.mxu1 %vm135_vm2, %v979_v31  ;;  %4652 = vmatprep.mubr.msk.f32.mxu1 %vm5093_vm1, %v5092_v8 }
 0x58a   :  { %4655 = vmatprep.subr.mxu1 %v5092_v8 }
 0x58c   :  { %4653 = vmatmul.mubr.msk.f32.vlgmr.msra.gmra.mrb[12].mxu1 %vm135_vm2, %v977_v18 }
 0x58d   :  { %4656 = vmatpush3.xpose.msk.msra.mxu1 %vm135_vm2, %v1057_v19  ;;  %4657 = vmatprep.mubr.msk.f32.mxu1 %vm5093_vm1, %v5092_v8 }
 0x58e   :  { %4665 = vmatprep.subr.mxu1 %v5092_v8 }
 0x590   :  { %4658 = vmatmul.mubr.msk.f32.vlgmr.msra.gmra.mrb[14].mxu1 %vm135_vm2, %v1055_v20 }
 0x591   :  { %4667 = vmatprep.mubr.msk.f32.mxu1 %vm5093_vm1, %v5092_v8 }
 0x5bb   :  { %v652_v32 = vpop.xlane.xlu0 %651 }
 0x5bc   :  { %5016 = vrcp.f32 %v652_v32 }
 0x5bf   :  { %v661_v33 = vpop.permute.xlu0 %660 }
 0x5c0   :  { %4631 = vmatpush3.msra.mxu0 %v661_v33 }
 0x5c1   :  { %4640 = vmatprep.subr.mxu0 %v4352_v37 }
 0x5c3   :  { %v1235_v34 = vpop.permute.xlu0 %1234 }
 0x5c4   :  { %4666 = vmatpush3.msra.mxu1 %v1235_v34 }
 0x5c5   :  { %4675 = vmatprep.subr.mxu1 %v5092_v8 }
 0x5c6   :  { %v5017_v35 = vpop.eup %5016 }
 0x5c7   :  { %v658_v36 = vmul.f32 %v5017_v35, %v5013_v25  ;;  %v1398_v3 = vpop.permute.xlu0 %1397 }
 0x5c9   :  { %4633 = vmatmul.mubr.msk.f32.vlgmr.msra.gmra.mrb[4].mxu0 %vm135_vm2, %v658_v36 }
 0x5ca   :  { %4641 = vmatpush3.msra.mxu0 %v4352_v37 }
 0x5cb   :  { %4645 = vmatprep.subr.mxu0 %v477_v38  ;;  %v1476_v13 = vpop.permute.xlu0 %1475 }
 0x5cf   :  { %v1396_v15 = vpop.permute.xlu0 %1395 }
 0x65b   :  { %v808_v39 = vpop.f32.mrb[10].mxu1 }
 0x65c   :  { %v4639_v40 = vpop.f32.mrb[11].mxu1 }
 0x65f   :  { %v1050_v41 = vpop.f32.mrb[12].mxu1 }
 0x660   :  { %v1132_v42 = vmul.f32 0.35355338, %v1050_v41  ;;  %v4654_v43 = vpop.f32.mrb[13].mxu1 }
 0x662   :  { %v1134_v44 = vadd.f32 %v5221_v21, %v1132_v42 }
 0x663   :  { %v1128_v45 = vpop.f32.mrb[14].mxu1 }
 0x664   :  { %v1133_v46 = vmul.f32 0.35355338, %v1128_v45  ;;  %v4659_v47 = vpop.f32.mrb[15].mxu1  ;;  %v1136_v48 = vsel %vm135_vm2, %v1134_v44, -inf }
 0x665   :  { %1137 = vmax.xlane.f32.xlu1 %v1136_v48 }
 0x666   :  { %v1135_v49 = vadd.f32 %v5227_v26, %v1133_v46 }
 0x668   :  { %v1139_v50 = vsel %vm135_vm2, %v1135_v49, -inf }
 0x669   :  { %1140 = vmax.xlane.f32.xlu1 %v1139_v50 }
 0x69c   :  { %v732_v51 = vpop.f32.mrb[4].mxu0 }
 0x69d   :  { %v4634_v52 = vpop.f32.mrb[5].mxu0  ;;  %4642 = vmatprep.mubr.msk.f32.mxu0 %vm135_vm2, %v732_v51 }
 0x69e   :  { %4643 = vmatmul.mubr.msk.f32.vlgmr.msra.gmra.mrb[6].mxu0 %vm135_vm2, %v808_v39 }
 0x69f   :  { %4647 = vmatprep.mubr.msk.f32.mxu0 %vm135_vm2, %v5264_v55  ;;  %4646 = vmatpush3.msra.mxu0 %v477_v38 }
 0x6a0   :  { %4660 = vmatprep.subr.mxu0 %v5092_v8 }
 0x6a6   :  { %4648 = vmatmul.mubr.msk.f32.vlgmr.msra.gmra.mrb[6].mxu0 %vm135_vm2, %v5266_v58 }
 0x6a7   :  { %4662 = vmatprep.mubr.msk.f32.mxu0 %vm5093_vm1, %v5092_v8 }
 0x6f2   :  { %v1138_v53 = vpop.xlane.xlu1 %1137 }
 0x6f3   :  { %v1142_v54 = vsub.f32 %v1134_v44, %v1138_v53 }
 0x6f5   :  { %v1144_v56 = vmul.f32 1.442695, %v1142_v54 }
 0x6f6   :  { %v1141_v57 = vpop.xlane.xlu1 %1140 }
 0x6f7   :  { %5018 = vpow2.f32 %v1144_v56  ;;  %v1143_v59 = vsub.f32 %v1135_v49, %v1141_v57  ;;  %v4372_v49 = vld [vmem:[%s5784_s3 + $0x18] sm:$0xff]  ;;  %v1816_v57 = vsub.s32 1, %v5183_v10 }
 0x6f9   :  { %v1146_v60 = vmul.f32 1.442695, %v1143_v59  ;;  %v1817_v59 = vrot.slane %v5193_v12, %v1816_v57 }
 0x6fb   :  { %5020 = vpow2.f32 %v1146_v60 }
 0x701   :  { %v5019_v61 = vpop.eup %5018 }
 0x702   :  { %v1148_v55 = vsel %vm135_vm2, %v5019_v61, 0.0 }
 0x703   :  { %1149 = vadd.xlane.f32.xlu1 %v1148_v55 }
 0x705   :  { %v5021_v62 = vpop.eup %5020 }
 0x706   :  { %v1151_v63 = vsel %vm135_vm2, %v5021_v62, 0.0 }
 0x707   :  { %1152 = vadd.xlane.f32.xlu1 %v1151_v63 }
 0x718   :  { %1158 = vrot.lane.b32.xlu1 %v5198_v16, %s5101_s13 }
 0x71c   :  { %1473 = vrot.lane.b32.xlu1 %v5202_v17, %s5103_s15 }
 0x790   :  { %v1150_v58 = vpop.xlane.xlu1 %1149 }
 0x791   :  { %5022 = vrcp.f32 %v1150_v58 }
 0x794   :  { %v1153_v0 = vpop.xlane.xlu1 %1152 }
 0x795   :  { %5024 = vrcp.f32 %v1153_v0 }
 0x798   :  { %v1159_v2 = vpop.permute.xlu1 %1158 }
 0x799   :  { %4661 = vmatpush3.msra.mxu0 %v1159_v2 }
 0x79a   :  { %4670 = vmatprep.subr.mxu0 %v4363_v1 }
 0x79b   :  { %v5023_v4 = vpop.eup %5022 }
 0x79c   :  { %v1156_v6 = vmul.f32 %v5023_v4, %v5019_v61  ;;  %v1474_v23 = vpop.permute.xlu1 %1473 }
 0x79e   :  { %4663 = vmatmul.mubr.msk.f32.vlgmr.msra.gmra.mrb[8].mxu0 %vm135_vm2, %v1156_v6 }
 0x79f   :  { %v5025_v9 = vpop.eup %5024  ;;  %4671 = vmatpush3.msra.mxu0 %v4363_v1 }
 0x7a0   :  { %v1157_v14 = vmul.f32 %v5025_v9, %v5021_v62  ;;  %4680 = vmatprep.subr.mxu0 %v5092_v8 }
 0x7a2   :  { %4668 = vmatmul.mubr.msk.f32.vlgmr.msra.gmra.mrb[16].mxu1 %vm135_vm2, %v1157_v14 }
 0x7a3   :  { %4676 = vmatpush3.xpose.msk.msra.mxu1 %vm135_vm2, %v1398_v3  ;;  %4677 = vmatprep.mubr.msk.f32.mxu1 %vm5093_vm1, %v5092_v8 }
 0x7a4   :  { %4685 = vmatprep.subr.mxu1 %v5092_v8 }
 0x7a6   :  { %4678 = vmatmul.mubr.msk.f32.vlgmr.msra.gmra.mrb[18].mxu1 %vm135_vm2, %v1396_v15 }
 0x7a7   :  { %4687 = vmatprep.mubr.msk.f32.mxu1 %vm5093_vm1, %v5092_v8 }
 0x871   :  { %v1230_v18 = vpop.f32.mrb[8].mxu0 }
 0x872   :  { %v4664_v19 = vpop.f32.mrb[9].mxu0  ;;  %4672 = vmatprep.mubr.msk.f32.mxu0 %vm135_vm2, %v1230_v18 }
 0x873   :  { %v1862_v19 = vld [vmem:[%s5785_s4 + $0x8] sm:$0xff] }
 0x875   :  { %v1306_v20 = vpop.f32.mrb[16].mxu1 }
 0x876   :  { %v4669_v22 = vpop.f32.mrb[17].mxu1  ;;  %4673 = vmatmul.mubr.msk.f32.vlgmr.msra.gmra.mrb[6].mxu0 %vm135_vm2, %v1306_v20 }
 0x877   :  { %4681 = vmatpush3.xpose.msk.msra.mxu0 %vm135_vm2, %v1476_v13  ;;  %4682 = vmatprep.mubr.msk.f32.mxu0 %vm5093_vm1, %v5092_v8  ;;  %v1863_v22 = vld [vmem:[%s5785_s4 + $0x10] sm:$0xff] }
 0x878   :  { %4690 = vmatprep.subr.mxu0 %v5092_v8 }
 0x879   :  { %v1469_v24 = vpop.f32.mrb[18].mxu1 }
 0x87a   :  { %v1551_v25 = vmul.f32 0.35355338, %v1469_v24  ;;  %v4679_v27 = vpop.f32.mrb[19].mxu1  ;;  %4683 = vmatmul.mubr.msk.f32.vlgmr.msra.gmra.mrb[10].mxu0 %vm135_vm2, %v1474_v23  ;;  %v1864_v23 = vld [vmem:[%s5785_s4 + $0x18] sm:$0xff] }
 0x87b   :  { %4692 = vmatprep.mubr.msk.f32.mxu0 %vm5093_vm1, %v5092_v8  ;;  %v4905_v24 = vpack.c.bf16 %v1864_v23, %v1863_v22  ;;  %v1978_v22 = vsub.s32 5, %v5183_v10 }
 0x87c   :  { %v1553_v28 = vadd.f32 %v5221_v21, %v1551_v25 }
 0x87d   :  { %v1979_v23 = vrot.slane %v5193_v12, %v1978_v22 }
 0x87e   :  { %v1555_v29 = vsel %vm135_vm2, %v1553_v28, -inf }
 0x87f   :  { %1556 = vmax.xlane.f32.xlu0 %v1555_v29 }
 0x90c   :  { %v1557_v30 = vpop.xlane.xlu0 %1556 }
 0x90d   :  { %v1561_v31 = vsub.f32 %v1553_v28, %v1557_v30 }
 0x90f   :  { %v1563_v32 = vmul.f32 1.442695, %v1561_v31 }
 0x911   :  { %5026 = vpow2.f32 %v1563_v32  ;;  %v1851_v32 = vsub.s32 2, %v5183_v10 }
 0x91b   :  { %v5027_v33 = vpop.eup %5026 }
 0x91c   :  { %v1567_v34 = vsel %vm135_vm2, %v5027_v33, 0.0 }
 0x91d   :  { %1568 = vadd.xlane.f32.xlu0 %v1567_v34  ;;  %v1852_v34 = vrot.slane %v5193_v12, %v1851_v32 }
 0x94d   :  { %v1547_v35 = vpop.f32.mrb[10].mxu0 }
 0x94e   :  { %v1552_v36 = vmul.f32 0.35355338, %v1547_v35  ;;  %v4684_v37 = vpop.f32.mrb[11].mxu0 }
 0x950   :  { %v1554_v38 = vadd.f32 %v5227_v26, %v1552_v36 }
 0x952   :  { %v1558_v39 = vsel %vm135_vm2, %v1554_v38, -inf }
 0x953   :  { %1559 = vmax.xlane.f32.xlu1 %v1558_v39 }
 0x964   :  { %1577 = vrot.lane.b32.xlu1 %v5198_v16, %s5104_s22 }
 0x9aa   :  { %v1569_v40 = vpop.xlane.xlu0 %1568 }
 0x9ab   :  { %5028 = vrcp.f32 %v1569_v40 }
 0x9b5   :  { %v5029_v42 = vpop.eup %5028 }
 0x9b6   :  { %v1575_v45 = vmul.f32 %v5029_v42, %v5027_v33  ;;  %v1857_v33 = vsub.s32 3, %v5183_v10 }
 0x9b8   :  { %v1858_v39 = vrot.slane %v5193_v12, %v1857_v33 }
 0x9e0   :  { %v1560_v41 = vpop.xlane.xlu1 %1559 }
 0x9e1   :  { %v1562_v43 = vsub.f32 %v1554_v38, %v1560_v41 }
 0x9e3   :  { %v1565_v44 = vmul.f32 1.442695, %v1562_v43 }
 0x9e4   :  { %v1578_v46 = vpop.permute.xlu1 %1577 }
 0x9e5   :  { %5030 = vpow2.f32 %v1565_v44  ;;  %4686 = vmatpush3.msra.mxu1 %v1578_v46  ;;  %v1968_v44 = vld [vmem:[%s5786_s5] sm:$0xff] }
 0x9e6   :  { %4688 = vmatmul.mubr.msk.f32.vlgmr.msra.gmra.mrb[20].mxu1 %vm135_vm2, %v1575_v45  ;;  %v1969_v45 = vld [vmem:[%s5786_s5 + $0x8] sm:$0xff] }
 0x9e7   :  { %v4909_v46 = vpack.c.bf16 %v1969_v45, %v1968_v44 }
 0x9ef   :  { %v5031_v47 = vpop.eup %5030 }
 0x9f0   :  { %v1570_v48 = vsel %vm135_vm2, %v5031_v47, 0.0 }
 0x9f1   :  { %1571 = vadd.xlane.f32.xlu0 %v1570_v48  ;;  %v1971_v48 = vld [vmem:[%s5786_s5 + $0x18] sm:$0xff] }
 0xa07   :  { %1653 = vrot.lane.b32.xlu0 %v5202_v17, %s5104_s22 }
 0xa7e   :  { %v1572_v16 = vpop.xlane.xlu0 %1571 }
 0xa7f   :  { %5032 = vrcp.f32 %v1572_v16 }
 0xa82   :  { %v1654_v50 = vpop.permute.xlu0 %1653 }
 0xa83   :  { %4691 = vmatpush3.msra.mxu0 %v1654_v50  ;;  %v1973_v50 = vld [vmem:[%s5786_s5 + $0x28] sm:$0xff] }
 0xa84   :  { %4695 = vmatprep.subr.mxu0 %v4372_v49 }
 0xa89   :  { %v5033_v51 = vpop.eup %5032 }
 0xa8a   :  { %v1576_v52 = vmul.f32 %v5033_v51, %v5031_v47  ;;  %v1970_v47 = vld [vmem:[%s5786_s5 + $0x10] sm:$0xff] }
 0xa8b   :  { %v4913_v16 = vpack.c.bf16 %v1971_v48, %v1970_v47  ;;  %v36_v48 = vld [vmem:[%s5787_s7 + $0x10] sm:$0xff] }
 0xa8c   :  { %4693 = vmatmul.mubr.msk.f32.vlgmr.msra.gmra.mrb[12].mxu0 %vm135_vm2, %v1576_v52  ;;  %v1974_v52 = vld [vmem:[%s5786_s5 + $0x30] sm:$0xff] }
 0xa8d   :  { %4696 = vmatpush3.msra.mxu0 %v4372_v49  ;;  %v1972_v49 = vld [vmem:[%s5786_s5 + $0x20] sm:$0xff] }
 0xa8e   :  { %4910 = vmatprep.subr.bf16.mxu0 %v4909_v46  ;;  %v4917_v51 = vpack.c.bf16 %v1973_v50, %v1972_v49  ;;  %v4385_v50 = vld [vmem:[%s5780_s2 + $0x20] sm:$0xff] }
 0xab9   :  { %v1649_v53 = vpop.f32.mrb[20].mxu1 }
 0xaba   :  { %v4689_v54 = vpop.f32.mrb[21].mxu1  ;;  %4697 = vmatprep.mubr.msk.f32.mxu0 %vm135_vm2, %v1649_v53  ;;  %v1975_v53 = vld [vmem:[%s5786_s5 + $0x38] sm:$0xff] }
 0xabb   :  { %v4921_v54 = vpack.c.bf16 %v1975_v53, %v1974_v52 }
 0xb5f   :  { %v1725_v56 = vpop.f32.mrb[12].mxu0 }
 0xb60   :  { %v4694_v17 = vpop.f32.mrb[13].mxu0  ;;  %4698 = vmatmul.mubr.msk.f32.vlgmr.msra.gmra.mrb[6].mxu0 %vm135_vm2, %v1725_v56  ;;  %v1867_v56 = vsub.s32 4, %v5183_v10 }
 0xb61   :  { %4912 = vmatpush3.bf16.msra.mxu0 %v4909_v46  ;;  %v35_v46 = vld [vmem:[%s5787_s7 + $0x8] sm:$0xff] }
 0xb62   :  { %4914 = vmatprep.subr.bf16.mxu0 %v4913_v16  ;;  %v1868_v17 = vrot.slane %v5193_v12, %v1867_v56 }
 0xb65   :  { %4916 = vmatpush3.bf16.msra.mxu0 %v4913_v16  ;;  %v37_v16 = vld [vmem:[%s5787_s7 + $0x18] sm:$0xff] }
 0xb66   :  { %4918 = vmatprep.subr.bf16.mxu0 %v4917_v51  ;;  %v5467_v49 = vpack.c.bf16 %v37_v16, %v36_v48 }
 0xb69   :  { %4920 = vmatpush3.bf16.msra.mxu0 %v4917_v51  ;;  %v4386_v51 = vld [vmem:[%s5780_s2 + $0x28] sm:$0xff] }
 0xb6a   :  { %4922 = vmatprep.subr.bf16.mxu0 %v4921_v54  ;;  %v4933_v52 = vpack.c.bf16 %v4386_v51, %v4385_v50 }
 0xb6d   :  { %4924 = vmatpush3.bf16.msra.mxu0 %v4921_v54 }
 0xb6e   :  { %4752 = vmatprep.subr.mxu0 %v5092_v8 }
 0xc33   :  { %v4699_v60 = vpop.f32.mrb[6].mxu0 }
 0xc34   :  { %v1819_v61 = vadd.f32 %v4699_v60, %v1817_v59  ;;  %v1803_v55 = vpop.f32.mrb[7].mxu0 }
 0xc35   :  { %v1818_v62 = vadd.f32 %v1817_v59, %v1803_v55 }
 0xc36   :  { %v1821_v63 = vadd.f32 %v1819_v61, %v5177_v7 }
 0xc37   :  { %v1820_v58 = vadd.f32 %v1818_v62, %v5170_v5  ;;  %v1861_v5 = vld [vmem:[%s5785_s4] sm:$0xff] }
 0xc38   :  { %v1825_v0 = vsel %vm50_vm0, %v1821_v63, 0.0  ;;  %v4901_v20 = vpack.c.bf16 %v1862_v19, %v1861_v5 }
 0xc39   :  { %1826 = vadd.xlane.f32.xlu0 %v1825_v0  ;;  %v1822_v1 = vsel %vm50_vm0, %v1820_v58, 0.0 }
 0xc3a   :  { %1823 = vadd.xlane.f32.xlu1 %v1822_v1  ;;  %4902 = vmatprep.subr.bf16.mxu1 %v4901_v20 }
 0xc3b   :  { %4904 = vmatpush3.bf16.msra.mxu1 %v4901_v20 }
 0xc3c   :  { %4906 = vmatprep.subr.bf16.mxu1 %v4905_v24 }
 0xc3f   :  { %4908 = vmatpush3.bf16.msra.mxu1 %v4905_v24 }
 0xcc6   :  { %v1827_v2 = vpop.xlane.xlu0 %1826 }
 0xcc7   :  { %v1830_v3 = vmul.f32 0.03125, %v1827_v2  ;;  %v1824_v4 = vpop.xlane.xlu1 %1823 }
 0xcc8   :  { %v1829_v6 = vmul.f32 0.03125, %v1824_v4 }
 0xcc9   :  { %v1832_v9 = vsub.f32 %v1821_v63, %v1830_v3 }
 0xcca   :  { %v1831_v13 = vsub.f32 %v1820_v58, %v1829_v6 }
 0xccb   :  { %v1834_v14 = vmul.f32 %v1832_v9, %v1832_v9 }
 0xccc   :  { %v1833_v15 = vmul.f32 %v1831_v13, %v1831_v13 }
 0xccd   :  { %v1838_v18 = vsel %vm50_vm0, %v1834_v14, 0.0 }
 0xcce   :  { %1839 = vadd.xlane.f32.xlu0 %v1838_v18  ;;  %v1835_v7 = vsel %vm50_vm0, %v1833_v15, 0.0 }
 0xccf   :  { %1836 = vadd.xlane.f32.xlu1 %v1835_v7 }
 0xd5b   :  { %v1840_v25 = vpop.xlane.xlu0 %1839 }
 0xd5c   :  { %v1842_v27 = vmul.f32 0.03125, %v1840_v25  ;;  %v1837_v28 = vpop.xlane.xlu1 %1836 }
 0xd5d   :  { %v1841_v29 = vmul.f32 0.03125, %v1837_v28 }
 0xd5e   :  { %v1844_v30 = vadd.f32 1e-12, %v1842_v27 }
 0xd5f   :  { %v1843_v31 = vadd.f32 1e-12, %v1841_v29 }
 0xd60   :  { %5034 = vrsqrt.f32 %v1844_v30 }
 0xd61   :  { %5036 = vrsqrt.f32 %v1843_v31 }
 0xd6a   :  { %v5035_v35 = vpop.eup %5034 }
 0xd6b   :  { %v5037_v36 = vpop.eup %5036  ;;  %v1848_v37 = vmul.f32 %v5035_v35, %v1832_v9 }
 0xd6c   :  { %v1847_v38 = vmul.f32 %v5037_v36, %v1831_v13 }
 0xd6d   :  { %v1854_v40 = vmul.f32 %v1852_v34, %v1848_v37 }
 0xd6e   :  { %v1853_v41 = vmul.f32 %v1852_v34, %v1847_v38 }
 0xd6f   :  { %v1860_v43 = vadd.f32 %v1858_v39, %v1854_v40 }
 0xd70   :  { %v5404_v42 = vadd.f32 %v1858_v39, %v1853_v41 }
 0xd72   :  { %4708 = vmatprep.mubr.msk.f32.mxu1 %vm50_vm0, %v5404_v42 }
 0xd73   :  { %4709 = vmatmul.mubr.msk.f32.vlgmr.msra.gmra.mrb[22].mxu1 %vm50_vm0, %v1860_v43 }
 0xe46   :  { %v4710_v59 = vpop.f32.mrb[22].mxu1 }
 0xe47   :  { %v1947_v60 = vadd.f32 %v4710_v59, %v1868_v17  ;;  %v1941_v61 = vpop.f32.mrb[23].mxu1 }
 0xe48   :  { %v1942_v55 = vadd.f32 %v1941_v61, %v1868_v17 }
 0xe49   :  { %v1951_v62 = vmul.f32 %v1947_v60, %v1947_v60 }
 0xe4a   :  { %v1950_v63 = vmul.f32 %v1942_v55, %v1942_v55 }
 0xe4b   :  { %v1953_v58 = vmul.f32 %v1951_v62, %v1947_v60  ;;  %v2098_v62 = vsub.s32 7, %v5183_v10 }
 0xe4c   :  { %v1952_v0 = vmul.f32 %v1950_v63, %v1942_v55 }
 0xe4d   :  { %v1955_v1 = vmul.f32 0.044715, %v1953_v58 }
 0xe4e   :  { %v1954_v2 = vmul.f32 0.044715, %v1952_v0 }
 0xe4f   :  { %v1957_v3 = vadd.f32 %v1955_v1, %v1947_v60 }
 0xe50   :  { %v1956_v4 = vadd.f32 %v1954_v2, %v1942_v55 }
 0xe51   :  { %v1959_v6 = vmul.f32 0.7978846, %v1957_v3  ;;  %v2099_v3 = vrot.slane %v5193_v12, %v2098_v62 }
 0xe52   :  { %v1958_v9 = vmul.f32 0.7978846, %v1956_v4 }
 0xe53   :  { %5038 = vtanh.f32 %v1959_v6 }
 0xe54   :  { %5040 = vtanh.f32 %v1958_v9  ;;  %v4387_v9 = vld [vmem:[%s5780_s2 + $0x30] sm:$0xff] }
 0xe5d   :  { %v5039_v13 = vpop.eup %5038 }
 0xe5e   :  { %v5041_v14 = vpop.eup %5040  ;;  %v1963_v15 = vadd.f32 1.0, %v5039_v13  ;;  %v4388_v13 = vld [vmem:[%s5780_s2 + $0x38] sm:$0xff] }
 0xe5f   :  { %v1962_v18 = vadd.f32 1.0, %v5041_v14 }
 0xe60   :  { %v1965_v7 = vmul.f32 0.5, %v1963_v15 }
 0xe61   :  { %v1964_v5 = vmul.f32 0.5, %v1962_v18  ;;  %v4937_v18 = vpack.c.bf16 %v4388_v13, %v4387_v9 }
 0xe62   :  { %v1967_v20 = vmul.f32 %v1965_v7, %v1947_v60  ;;  %v5494_v7 = vld [vmem:[%s5781_s0 + $0x10] sm:$0xff] }
 0xe63   :  { %v1966_v19 = vmul.f32 %v1964_v5, %v1942_v55  ;;  %v2092_v55 = vsub.s32 6, %v5183_v10  ;;  %v5513_v5 = vld [vmem:[%s5782_s6 + $0x8] sm:$0xff] }
 0xe65   :  { %4727 = vmatprep.mubr.msk.f32.mxu0 %vm1980_vm3, %v1966_v19  ;;  %v2093_v63 = vrot.slane %v5193_v12, %v2092_v55  ;;  %v5503_v12 = vld [vmem:[%s5781_s0 + $0x18] sm:$0xff]  ;;  %v2202_v19 = vrot.slane %v5513_v5, %v48_v11 }
 0xe66   :  { %4728 = vmatmul.mubr.msk.f32.vlgmr.msra.gmra.mrb[14].mxu0 %vm1980_vm3, %v1967_v20 }
 0xe67   :  { %4754 = vmatprep.mubr.msk.f32.mxu0 %vm5093_vm1, %v5092_v8 }
 0xf39   :  { %v4729_v24 = vpop.f32.mrb[14].mxu0 }
 0xf3a   :  { %v2059_v25 = vadd.f32 %v4729_v24, %v1979_v23  ;;  %v2053_v27 = vpop.f32.mrb[15].mxu0 }
 0xf3b   :  { %v2054_v28 = vadd.f32 %v2053_v27, %v1979_v23 }
 0xf3c   :  { %v2063_v29 = vadd.f32 %v2059_v25, %v1860_v43 }
 0xf3d   :  { %v2062_v30 = vadd.f32 %v2054_v28, %v5404_v42  ;;  %v34_v42 = vld [vmem:[%s5787_s7] sm:$0xff] }
 0xf3e   :  { %v2067_v31 = vsel %vm50_vm0, %v2063_v29, 0.0  ;;  %v5457_v47 = vpack.c.bf16 %v35_v46, %v34_v42 }
 0xf3f   :  { %2068 = vadd.xlane.f32.xlu0 %v2067_v31  ;;  %v2064_v34 = vsel %vm50_vm0, %v2062_v30, 0.0 }
 0xf40   :  { %2065 = vadd.xlane.f32.xlu1 %v2064_v34  ;;  %4926 = vmatprep.subr.bf16.mxu1 %v5457_v47 }
 0xf41   :  { %4928 = vmatpush3.bf16.msra.mxu1 %v5457_v47 }
 0xf42   :  { %4930 = vmatprep.subr.bf16.mxu1 %v5467_v49 }
 0xf45   :  { %4932 = vmatpush3.bf16.msra.mxu1 %v5467_v49 }
 0xf46   :  { %4934 = vmatprep.subr.bf16.mxu1 %v4933_v52 }
 0xfcc   :  { %v2069_v35 = vpop.xlane.xlu0 %2068 }
 0xfcd   :  { %v2071_v36 = vmul.f32 0.03125, %v2069_v35  ;;  %v2066_v37 = vpop.xlane.xlu1 %2065 }
 0xfce   :  { %v2070_v38 = vmul.f32 0.03125, %v2066_v37 }
 0xfcf   :  { %v2073_v39 = vsub.f32 %v2063_v29, %v2071_v36 }
 0xfd0   :  { %v2072_v40 = vsub.f32 %v2062_v30, %v2070_v38 }
 0xfd1   :  { %v2075_v41 = vmul.f32 %v2073_v39, %v2073_v39 }
 0xfd2   :  { %v2074_v44 = vmul.f32 %v2072_v40, %v2072_v40 }
 0xfd3   :  { %v2079_v45 = vsel %vm50_vm0, %v2075_v41, 0.0 }
 0xfd4   :  { %2080 = vadd.xlane.f32.xlu0 %v2079_v45  ;;  %v2076_v43 = vsel %vm50_vm0, %v2074_v44, 0.0 }
 0xfd5   :  { %2077 = vadd.xlane.f32.xlu1 %v2076_v43 }
0x1061   :  { %v2081_v53 = vpop.xlane.xlu0 %2080 }
0x1062   :  { %v2083_v54 = vmul.f32 0.03125, %v2081_v53  ;;  %v2078_v17 = vpop.xlane.xlu1 %2077 }
0x1063   :  { %v2082_v59 = vmul.f32 0.03125, %v2078_v17 }
0x1064   :  { %v2085_v60 = vadd.f32 1e-12, %v2083_v54 }
0x1065   :  { %v2084_v61 = vadd.f32 1e-12, %v2082_v59 }
0x1066   :  { %5042 = vrsqrt.f32 %v2085_v60 }
0x1067   :  { %5044 = vrsqrt.f32 %v2084_v61 }
0x1070   :  { %v5043_v58 = vpop.eup %5042 }
0x1071   :  { %v5045_v0 = vpop.eup %5044  ;;  %v2089_v1 = vmul.f32 %v5043_v58, %v2073_v39 }
0x1072   :  { %v2088_v2 = vmul.f32 %v5045_v0, %v2072_v40 }
0x1073   :  { %v2095_v4 = vmul.f32 %v2093_v63, %v2089_v1 }
0x1074   :  { %v2094_v6 = vmul.f32 %v2093_v63, %v2088_v2 }
0x1075   :  { %v2101_v15 = vadd.f32 %v2099_v3, %v2095_v4 }
0x1076   :  { %v2100_v14 = vadd.f32 %v2099_v3, %v2094_v6  ;;  %v5581_v6 = vld [vmem:[%s5783_s1 + $0x1] ss:$0 sm:$0xff] }
0x1078   :  { %4738 = vmatprep.mubr.msk.f32.mxu1 %vm50_vm0, %v2100_v14 }
0x1079   :  { %4739 = vmatmul.mubr.msk.f32.vlgmr.msra.gmra.mrb[24].mxu1 %vm50_vm0, %v2101_v15 }
0x107a   :  { %4936 = vmatpush3.bf16.msra.mxu1 %v4933_v52  ;;  %4749 = vmatprep.mubr.msk.f32.mxu1 %vm50_vm0, %v5494_v7 }
0x107b   :  { %4938 = vmatprep.subr.bf16.mxu1 %v4937_v18 }
0x107e   :  { %4940 = vmatpush3.bf16.msra.mxu1 %v4937_v18 }
0x107f   :  { %4757 = vmatprep.subr.mxu1 %v5092_v8 }
0x1081   :  { %4750 = vmatmul.mubr.msk.f32.vlgmr.msra.gmra.mrb[26].mxu1 %vm50_vm0, %v5503_v12 }
0x1082   :  { %4759 = vmatprep.mubr.msk.f32.mxu1 %vm5093_vm1, %v5092_v8 }
0x1154   :  { %v4751_v20 = vpop.f32.mrb[26].mxu1 }
0x1155   :  { %v5518_v23 = vadd.f32 %v4751_v20, %v2202_v19  ;;  %v2275_v24 = vpop.f32.mrb[27].mxu1 }
0x1156   :  { %v5520_v25 = vadd.f32 %v2275_v24, %v2202_v19 }
0x1157   :  { %2362 = vrot.lane.b32.xlu1 %v5518_v23, %s5094_s23 }
0x1158   :  { %2285 = vrot.lane.b32.xlu0 %v5520_v25, %s5094_s23 }
0x11c9   :  { %v2363_v27 = vpop.permute.xlu1 %2362 }
0x11ca   :  { %4758 = vmatpush3.xpose.msk.msra.mxu1 %vm135_vm2, %v2363_v27  ;;  %v2286_v28 = vpop.permute.xlu0 %2285 }
0x11cb   :  { %4753 = vmatpush3.xpose.msk.msra.mxu0 %vm135_vm2, %v2286_v28  ;;  %4767 = vmatprep.subr.mxu1 %v5092_v8 }
0x11cc   :  { %4762 = vmatprep.subr.mxu0 %v5092_v8 }
0x11cd   :  { %4760 = vmatmul.mubr.msk.f32.vlgmr.msra.gmra.mrb[28].mxu1 %vm135_vm2, %v5518_v23 }
0x11ce   :  { %4755 = vmatmul.mubr.msk.f32.vlgmr.msra.gmra.mrb[16].mxu0 %vm135_vm2, %v5520_v25  ;;  %4769 = vmatprep.mubr.msk.f32.mxu1 %vm5093_vm1, %v5092_v8 }
0x11cf   :  { %4764 = vmatprep.mubr.msk.f32.mxu0 %vm5093_vm1, %v5092_v8 }
0x12a0   :  { %v2434_v11 = vpop.f32.mrb[28].mxu1 }
0x12a1   :  { %v2439_v29 = vmul.f32 0.35355338, %v2434_v11  ;;  %v2357_v30 = vpop.f32.mrb[16].mxu0  ;;  %v4761_v31 = vpop.f32.mrb[29].mxu1 }
0x12a2   :  { %v4756_v34 = vpop.f32.mrb[17].mxu0  ;;  %v2438_v37 = vmul.f32 0.35355338, %v2357_v30  ;;  %v5600_v31 = vld [vmem:[%s5783_s1] ss:$0 sm:$0xff] }
0x12a3   :  { %v2441_v35 = vadd.f32 %v5227_v26, %v2439_v29 }
0x12a4   :  { %v2440_v38 = vadd.f32 %v5221_v21, %v2438_v37 }
0x12a5   :  { %v2445_v36 = vsel %vm135_vm2, %v2441_v35, -inf }
0x12a6   :  { %2446 = vmax.xlane.f32.xlu1 %v2445_v36  ;;  %v2442_v39 = vsel %vm135_vm2, %v2440_v38, -inf }
0x12b7   :  { %2540 = vrot.lane.b32.xlu1 %v5518_v23, %s5095_s28 }
0x12bb   :  { %2696 = vrot.lane.b32.xlu1 %v5518_v23, %s5097_s30 }
0x12df   :  { %2443 = vmax.xlane.f32.xlu1 %v2442_v39 }
0x12f0   :  { %2620 = vrot.lane.b32.xlu1 %v5520_v25, %s5096_s29 }
0x12f4   :  { %2618 = vrot.lane.b32.xlu1 %v5520_v25, %s5097_s30 }
0x12f8   :  { %3118 = vrot.lane.b32.xlu1 %v5520_v25, %s5100_s12 }
0x1333   :  { %v2447_v26 = vpop.xlane.xlu1 %2446 }
0x1334   :  { %v2449_v40 = vsub.f32 %v2441_v35, %v2447_v26 }
0x1336   :  { %v2452_v41 = vmul.f32 1.442695, %v2449_v40 }
0x1337   :  { %v2541_v44 = vpop.permute.xlu1 %2540 }
0x1338   :  { %5046 = vpow2.f32 %v2452_v41  ;;  %4768 = vmatpush3.msra.mxu1 %v2541_v44 }
0x1339   :  { %4777 = vmatprep.subr.mxu1 %v5092_v8 }
0x133b   :  { %v2697_v43 = vpop.permute.xlu1 %2696 }
0x1342   :  { %v5047_v21 = vpop.eup %5046 }
0x1343   :  { %v2457_v45 = vsel %vm135_vm2, %v5047_v21, 0.0 }
0x1344   :  { %2458 = vadd.xlane.f32.xlu0 %v2457_v45 }
0x135a   :  { %2698 = vrot.lane.b32.xlu0 %v5518_v23, %s5096_s29 }
0x136c   :  { %v2444_v42 = vpop.xlane.xlu1 %2443 }
0x136d   :  { %v2448_v46 = vsub.f32 %v2440_v38, %v2444_v42 }
0x136f   :  { %v2450_v48 = vmul.f32 1.442695, %v2448_v46 }
0x1370   :  { %v2621_v61 = vpop.permute.xlu1 %2620 }
0x1371   :  { %5048 = vpow2.f32 %v2450_v48 }
0x1374   :  { %v2619_v58 = vpop.permute.xlu1 %2618 }
0x1378   :  { %v3119_v36 = vpop.permute.xlu1 %3118 }
0x137b   :  { %v5049_v16 = vpop.eup %5048 }
0x137c   :  { %v2454_v50 = vsel %vm135_vm2, %v5049_v16, 0.0 }
0x137d   :  { %2455 = vadd.xlane.f32.xlu0 %v2454_v50 }
0x1393   :  { %2464 = vrot.lane.b32.xlu0 %v5520_v25, %s5095_s28 }
0x13d1   :  { %v2459_v51 = vpop.xlane.xlu0 %2458 }
0x13d2   :  { %5050 = vrcp.f32 %v2459_v51 }
0x13d5   :  { %v2699_v54 = vpop.permute.xlu0 %2698 }
0x13dc   :  { %v5051_v52 = vpop.eup %5050 }
0x13dd   :  { %v2463_v53 = vmul.f32 %v5051_v52, %v5047_v21 }
0x13df   :  { %4770 = vmatmul.mubr.msk.f32.vlgmr.msra.gmra.mrb[30].mxu1 %vm135_vm2, %v2463_v53 }
0x13e0   :  { %4778 = vmatpush3.xpose.msk.msra.mxu1 %vm135_vm2, %v2699_v54  ;;  %4779 = vmatprep.mubr.msk.f32.mxu1 %vm5093_vm1, %v5092_v8 }
0x13e1   :  { %4787 = vmatprep.subr.mxu1 %v5092_v8 }
0x13e3   :  { %4780 = vmatmul.mubr.msk.f32.vlgmr.msra.gmra.mrb[32].mxu1 %vm135_vm2, %v2697_v43 }
0x13e4   :  { %4789 = vmatprep.mubr.msk.f32.mxu1 %vm5093_vm1, %v5092_v8 }
0x140a   :  { %v2456_v17 = vpop.xlane.xlu0 %2455 }
0x140b   :  { %5052 = vrcp.f32 %v2456_v17 }
0x140e   :  { %v2465_v59 = vpop.permute.xlu0 %2464 }
0x140f   :  { %4763 = vmatpush3.msra.mxu0 %v2465_v59 }
0x1410   :  { %4772 = vmatprep.subr.mxu0 %v5092_v8 }
0x1415   :  { %v5053_v60 = vpop.eup %5052 }
0x1416   :  { %v2462_v63 = vmul.f32 %v5053_v60, %v5049_v16 }
0x1418   :  { %4765 = vmatmul.mubr.msk.f32.vlgmr.msra.gmra.mrb[18].mxu0 %vm135_vm2, %v2462_v63 }
0x1419   :  { %4773 = vmatpush3.xpose.msk.msra.mxu0 %vm135_vm2, %v2621_v61  ;;  %4774 = vmatprep.mubr.msk.f32.mxu0 %vm5093_vm1, %v5092_v8 }
0x141a   :  { %4782 = vmatprep.subr.mxu0 %v5092_v8 }
0x141c   :  { %4775 = vmatmul.mubr.msk.f32.vlgmr.msra.gmra.mrb[20].mxu0 %vm135_vm2, %v2619_v58 }
0x141d   :  { %4784 = vmatprep.mubr.msk.f32.mxu0 %vm5093_vm1, %v5092_v8 }
0x14b2   :  { %v5576_v0 = vpop.f32.mrb[30].mxu1 }
0x14b3   :  { %v4771_v1 = vpop.f32.mrb[31].mxu1 }
0x14b6   :  { %v2770_v2 = vpop.f32.mrb[32].mxu1 }
0x14b7   :  { %v2775_v3 = vmul.f32 0.35355338, %v2770_v2  ;;  %v4781_v4 = vpop.f32.mrb[33].mxu1 }
0x14b8   :  { %v4404_v4 = vld [vmem:[%s5784_s3 + $0x28] sm:$0xff] }
0x14b9   :  { %v2777_v9 = vadd.f32 %v5581_v6, %v2775_v3 }
0x14bb   :  { %v2781_v13 = vsel %vm135_vm2, %v2777_v9, -inf }
0x14bc   :  { %2782 = vmax.xlane.f32.xlu0 %v2781_v13 }
0x14d2   :  { %2876 = vrot.lane.b32.xlu0 %v5518_v23, %s5098_s10 }
0x14d6   :  { %3116 = vrot.lane.b32.xlu0 %v5520_v25, %s5099_s11 }
0x14da   :  { %3194 = vrot.lane.b32.xlu0 %v5518_v23, %s5099_s11 }
0x14eb   :  { %v5591_v14 = vpop.f32.mrb[18].mxu0 }
0x14ec   :  { %v4766_v15 = vpop.f32.mrb[19].mxu0 }
0x14ef   :  { %v2692_v18 = vpop.f32.mrb[20].mxu0 }
0x14f0   :  { %v4776_v19 = vpop.f32.mrb[21].mxu0  ;;  %v2774_v30 = vmul.f32 0.35355338, %v2692_v18 }
0x14f2   :  { %v2776_v34 = vadd.f32 %v5600_v31, %v2774_v30 }
0x14f4   :  { %v2778_v35 = vsel %vm135_vm2, %v2776_v34, -inf }
0x1549   :  { %v2783_v20 = vpop.xlane.xlu0 %2782 }
0x154a   :  { %v2785_v24 = vsub.f32 %v2777_v9, %v2783_v20  ;;  %v4397_v9 = vld [vmem:[%s5784_s3 + $0x20] sm:$0xff] }
0x154c   :  { %v2788_v27 = vmul.f32 1.442695, %v2785_v24 }
0x154d   :  { %v2877_v28 = vpop.permute.xlu0 %2876 }
0x154e   :  { %5054 = vpow2.f32 %v2788_v27  ;;  %4788 = vmatpush3.msra.mxu1 %v2877_v28 }
0x154f   :  { %4802 = vmatprep.subr.mxu1 %v5092_v8 }
0x1551   :  { %v3117_v26 = vpop.permute.xlu0 %3116 }
0x1555   :  { %v3195_v41 = vpop.permute.xlu0 %3194 }
0x1558   :  { %v5055_v11 = vpop.eup %5054 }
0x1559   :  { %v2793_v29 = vsel %vm135_vm2, %v5055_v11, 0.0 }
0x155a   :  { %2794 = vadd.xlane.f32.xlu1 %v2793_v29 }
0x156b   :  { %3196 = vrot.lane.b32.xlu1 %v5518_v23, %s5100_s12 }
0x158f   :  { %2779 = vmax.xlane.f32.xlu1 %v2778_v35 }
0x15e7   :  { %v2795_v37 = vpop.xlane.xlu1 %2794 }
0x15e8   :  { %5056 = vrcp.f32 %v2795_v37  ;;  %v4415_v37 = vld [vmem:[%s5784_s3 + $0x30] sm:$0xff] }
0x15eb   :  { %v3197_v40 = vpop.permute.xlu1 %3196 }
0x15f2   :  { %v5057_v38 = vpop.eup %5056 }
0x15f3   :  { %v2799_v39 = vmul.f32 %v5057_v38, %v5055_v11 }
0x15f5   :  { %4790 = vmatmul.mubr.msk.f32.vlgmr.msra.gmra.mrb[34].mxu1 %vm135_vm2, %v2799_v39 }
0x15f6   :  { %4803 = vmatpush3.xpose.msk.msra.mxu1 %vm135_vm2, %v3119_v36  ;;  %4804 = vmatprep.mubr.msk.f32.mxu1 %vm5093_vm1, %v5092_v8 }
0x15f7   :  { %4807 = vmatprep.subr.mxu1 %v5092_v8 }
0x15f9   :  { %4805 = vmatmul.mubr.msk.f32.vlgmr.msra.gmra.mrb[36].mxu1 %vm135_vm2, %v3117_v26 }
0x15fa   :  { %4808 = vmatpush3.xpose.msk.msra.mxu1 %vm135_vm2, %v3197_v40  ;;  %4809 = vmatprep.mubr.msk.f32.mxu1 %vm5093_vm1, %v5092_v8 }
0x15fb   :  { %4817 = vmatprep.subr.mxu1 %v5092_v8 }
0x15fd   :  { %4810 = vmatmul.mubr.msk.f32.vlgmr.msra.gmra.mrb[38].mxu1 %vm135_vm2, %v3195_v41 }
0x15fe   :  { %4819 = vmatprep.mubr.msk.f32.mxu1 %vm5093_vm1, %v5092_v8 }
0x161c   :  { %v2780_v44 = vpop.xlane.xlu1 %2779 }
0x161d   :  { %v2784_v21 = vsub.f32 %v2776_v34, %v2780_v44 }
0x161f   :  { %v2786_v45 = vmul.f32 1.442695, %v2784_v21 }
0x1621   :  { %5058 = vpow2.f32 %v2786_v45 }
0x162b   :  { %v5059_v43 = vpop.eup %5058 }
0x162c   :  { %v2790_v42 = vsel %vm135_vm2, %v5059_v43, 0.0 }
0x162d   :  { %2791 = vadd.xlane.f32.xlu0 %v2790_v42 }
0x1643   :  { %2800 = vrot.lane.b32.xlu0 %v5520_v25, %s5098_s10 }
0x1647   :  { %3374 = vrot.lane.b32.xlu0 %v5518_v23, %s5101_s13 }
0x164b   :  { %3537 = vrot.lane.b32.xlu0 %v5520_v25, %s5102_s14 }
0x164f   :  { %3615 = vrot.lane.b32.xlu0 %v5518_v23, %s5102_s14 }
0x1653   :  { %3535 = vrot.lane.b32.xlu0 %v5520_v25, %s5103_s15 }
0x16ba   :  { %v2792_v46 = vpop.xlane.xlu0 %2791 }
0x16bb   :  { %5060 = vrcp.f32 %v2792_v46 }
0x16be   :  { %v2801_v48 = vpop.permute.xlu0 %2800 }
0x16bf   :  { %4783 = vmatpush3.msra.mxu0 %v2801_v48 }
0x16c0   :  { %4792 = vmatprep.subr.mxu0 %v4404_v4 }
0x16c2   :  { %v3375_v16 = vpop.permute.xlu0 %3374 }
0x16c3   :  { %4818 = vmatpush3.msra.mxu1 %v3375_v16 }
0x16c4   :  { %4827 = vmatprep.subr.mxu1 %v5092_v8 }
0x16c5   :  { %v5061_v50 = vpop.eup %5060 }
0x16c6   :  { %v2798_v51 = vmul.f32 %v5061_v50, %v5059_v43  ;;  %v3538_v39 = vpop.permute.xlu0 %3537 }
0x16c8   :  { %4785 = vmatmul.mubr.msk.f32.vlgmr.msra.gmra.mrb[22].mxu0 %vm135_vm2, %v2798_v51  ;;  %v2948_v52 = vpop.f32.mrb[34].mxu1 }
0x16c9   :  { %v4791_v53 = vpop.f32.mrb[35].mxu1  ;;  %4793 = vmatpush3.msra.mxu0 %v4404_v4 }
0x16ca   :  { %4797 = vmatprep.subr.mxu0 %v4397_v9  ;;  %v3616_v40 = vpop.permute.xlu0 %3615 }
0x16cc   :  { %v3190_v54 = vpop.f32.mrb[36].mxu1 }
0x16cd   :  { %v3272_v17 = vmul.f32 0.35355338, %v3190_v54  ;;  %v4806_v59 = vpop.f32.mrb[37].mxu1 }
0x16ce   :  { %v3536_v44 = vpop.permute.xlu0 %3535 }
0x16cf   :  { %v3274_v60 = vadd.f32 %v5600_v31, %v3272_v17 }
0x16d0   :  { %v3268_v61 = vpop.f32.mrb[38].mxu1 }
0x16d1   :  { %v3273_v63 = vmul.f32 0.35355338, %v3268_v61  ;;  %v4811_v58 = vpop.f32.mrb[39].mxu1  ;;  %v3276_v1 = vsel %vm135_vm2, %v3274_v60, -inf }
0x16d2   :  { %3277 = vmax.xlane.f32.xlu1 %v3276_v1 }
0x16d3   :  { %v3275_v2 = vadd.f32 %v5581_v6, %v3273_v63 }
0x16d5   :  { %v3279_v3 = vsel %vm135_vm2, %v3275_v2, -inf }
0x16d6   :  { %3280 = vmax.xlane.f32.xlu1 %v3279_v3 }
0x175f   :  { %v3278_v13 = vpop.xlane.xlu1 %3277 }
0x1760   :  { %v3282_v15 = vsub.f32 %v3274_v60, %v3278_v13 }
0x1762   :  { %v3284_v18 = vmul.f32 1.442695, %v3282_v15 }
0x1763   :  { %v3281_v19 = vpop.xlane.xlu1 %3280 }
0x1764   :  { %5062 = vpow2.f32 %v3284_v18  ;;  %v3283_v20 = vsub.f32 %v3275_v2, %v3281_v19  ;;  %v4424_v19 = vld [vmem:[%s5784_s3 + $0x38] sm:$0xff] }
0x1766   :  { %v3286_v24 = vmul.f32 1.442695, %v3283_v20 }
0x1768   :  { %5064 = vpow2.f32 %v3286_v24 }
0x176e   :  { %v5063_v27 = vpop.eup %5062 }
0x176f   :  { %v3288_v28 = vsel %vm135_vm2, %v5063_v27, 0.0 }
0x1770   :  { %3289 = vadd.xlane.f32.xlu1 %v3288_v28 }
0x1772   :  { %v5065_v11 = vpop.eup %5064 }
0x1773   :  { %v3291_v29 = vsel %vm135_vm2, %v5065_v11, 0.0 }
0x1774   :  { %3292 = vadd.xlane.f32.xlu1 %v3291_v29 }
0x1785   :  { %3298 = vrot.lane.b32.xlu1 %v5520_v25, %s5101_s13 }
0x1789   :  { %3613 = vrot.lane.b32.xlu1 %v5518_v23, %s5103_s15 }
0x179b   :  { %v2872_v30 = vpop.f32.mrb[22].mxu0 }
0x179c   :  { %v4786_v34 = vpop.f32.mrb[23].mxu0  ;;  %4794 = vmatprep.mubr.msk.f32.mxu0 %vm135_vm2, %v2872_v30  ;;  %v3957_v30 = vrot.slane %v5513_v5, %v1816_v57 }
0x179d   :  { %4795 = vmatmul.mubr.msk.f32.vlgmr.msra.gmra.mrb[24].mxu0 %vm135_vm2, %v2948_v52 }
0x179e   :  { %4799 = vmatprep.mubr.msk.f32.mxu0 %vm135_vm2, %v5591_v14  ;;  %4798 = vmatpush3.msra.mxu0 %v4397_v9 }
0x179f   :  { %4812 = vmatprep.subr.mxu0 %v5092_v8 }
0x17a5   :  { %4800 = vmatmul.mubr.msk.f32.vlgmr.msra.gmra.mrb[24].mxu0 %vm135_vm2, %v5576_v0 }
0x17a6   :  { %4814 = vmatprep.mubr.msk.f32.mxu0 %vm5093_vm1, %v5092_v8 }
0x17fd   :  { %v3290_v35 = vpop.xlane.xlu1 %3289 }
0x17fe   :  { %5066 = vrcp.f32 %v3290_v35 }
0x1801   :  { %v3293_v36 = vpop.xlane.xlu1 %3292 }
0x1802   :  { %5068 = vrcp.f32 %v3293_v36 }
0x1805   :  { %v3299_v38 = vpop.permute.xlu1 %3298 }
0x1806   :  { %4813 = vmatpush3.msra.mxu0 %v3299_v38 }
0x1807   :  { %4822 = vmatprep.subr.mxu0 %v4415_v37 }
0x1808   :  { %v5067_v14 = vpop.eup %5066 }
0x1809   :  { %v3296_v26 = vmul.f32 %v5067_v14, %v5063_v27  ;;  %v3614_v46 = vpop.permute.xlu1 %3613 }
0x180b   :  { %4815 = vmatmul.mubr.msk.f32.vlgmr.msra.gmra.mrb[26].mxu0 %vm135_vm2, %v3296_v26 }
0x180c   :  { %v5069_v0 = vpop.eup %5068  ;;  %4823 = vmatpush3.msra.mxu0 %v4415_v37 }
0x180d   :  { %v3297_v41 = vmul.f32 %v5069_v0, %v5065_v11  ;;  %4832 = vmatprep.subr.mxu0 %v5092_v8 }
0x180f   :  { %4820 = vmatmul.mubr.msk.f32.vlgmr.msra.gmra.mrb[40].mxu1 %vm135_vm2, %v3297_v41 }
0x1810   :  { %4828 = vmatpush3.xpose.msk.msra.mxu1 %vm135_vm2, %v3538_v39  ;;  %4829 = vmatprep.mubr.msk.f32.mxu1 %vm5093_vm1, %v5092_v8 }
0x1811   :  { %4837 = vmatprep.subr.mxu1 %v5092_v8 }
0x1813   :  { %4830 = vmatmul.mubr.msk.f32.vlgmr.msra.gmra.mrb[42].mxu1 %vm135_vm2, %v3536_v44 }
0x1814   :  { %4839 = vmatprep.mubr.msk.f32.mxu1 %vm5093_vm1, %v5092_v8 }
0x18de   :  { %v3370_v21 = vpop.f32.mrb[26].mxu0 }
0x18df   :  { %v4816_v45 = vpop.f32.mrb[27].mxu0  ;;  %4824 = vmatprep.mubr.msk.f32.mxu0 %vm135_vm2, %v3370_v21 }
0x18e2   :  { %v3446_v43 = vpop.f32.mrb[40].mxu1 }
0x18e3   :  { %v4821_v42 = vpop.f32.mrb[41].mxu1  ;;  %4825 = vmatmul.mubr.msk.f32.vlgmr.msra.gmra.mrb[24].mxu0 %vm135_vm2, %v3446_v43 }
0x18e4   :  { %4833 = vmatpush3.xpose.msk.msra.mxu0 %vm135_vm2, %v3616_v40  ;;  %4834 = vmatprep.mubr.msk.f32.mxu0 %vm5093_vm1, %v5092_v8 }
0x18e5   :  { %4842 = vmatprep.subr.mxu0 %v5092_v8 }
0x18e6   :  { %v3609_v48 = vpop.f32.mrb[42].mxu1 }
0x18e7   :  { %v3691_v16 = vmul.f32 0.35355338, %v3609_v48  ;;  %v4831_v50 = vpop.f32.mrb[43].mxu1  ;;  %4835 = vmatmul.mubr.msk.f32.vlgmr.msra.gmra.mrb[28].mxu0 %vm135_vm2, %v3614_v46  ;;  %v4428_v46 = vld [vmem:[%s5785_s4 + $0x28] sm:$0xff] }
0x18e8   :  { %4844 = vmatprep.mubr.msk.f32.mxu0 %vm5093_vm1, %v5092_v8  ;;  %v4430_v50 = vld [vmem:[%s5785_s4 + $0x38] sm:$0xff] }
0x18e9   :  { %v3693_v51 = vadd.f32 %v5600_v31, %v3691_v16  ;;  %v4429_v16 = vld [vmem:[%s5785_s4 + $0x30] sm:$0xff] }
0x18eb   :  { %v3695_v52 = vsel %vm135_vm2, %v3693_v51, -inf }
0x18ec   :  { %3696 = vmax.xlane.f32.xlu0 %v3695_v52 }
0x1979   :  { %v3697_v53 = vpop.xlane.xlu0 %3696 }
0x197a   :  { %v3701_v54 = vsub.f32 %v3693_v51, %v3697_v53  ;;  %v4945_v51 = vpack.c.bf16 %v4430_v50, %v4429_v16 }
0x197c   :  { %v3703_v17 = vmul.f32 1.442695, %v3701_v54 }
0x197e   :  { %5070 = vpow2.f32 %v3703_v17 }
0x1988   :  { %v5071_v59 = vpop.eup %5070 }
0x1989   :  { %v3707_v60 = vsel %vm135_vm2, %v5071_v59, 0.0 }
0x198a   :  { %3708 = vadd.xlane.f32.xlu0 %v3707_v60 }
0x19ba   :  { %v3687_v61 = vpop.f32.mrb[28].mxu0 }
0x19bb   :  { %v3692_v63 = vmul.f32 0.35355338, %v3687_v61  ;;  %v4836_v58 = vpop.f32.mrb[29].mxu0  ;;  %v3991_v61 = vrot.slane %v5513_v5, %v1851_v32  ;;  %v4433_v32 = vld [vmem:[%s5786_s5 + $0x40] sm:$0xff] }
0x19bd   :  { %v3694_v1 = vadd.f32 %v5581_v6, %v3692_v63 }
0x19bf   :  { %v3698_v8 = vsel %vm135_vm2, %v3694_v1, -inf }
0x19c0   :  { %3699 = vmax.xlane.f32.xlu1 %v3698_v8 }
0x19d1   :  { %3717 = vrot.lane.b32.xlu1 %v5520_v25, %s5104_s22 }
0x1a17   :  { %v3709_v31 = vpop.xlane.xlu0 %3708 }
0x1a18   :  { %5072 = vrcp.f32 %v3709_v31  ;;  %v3997_v31 = vrot.slane %v5513_v5, %v1857_v33  ;;  %v4434_v33 = vld [vmem:[%s5786_s5 + $0x48] sm:$0xff] }
0x1a22   :  { %v5073_v3 = vpop.eup %5072 }
0x1a23   :  { %v3715_v13 = vmul.f32 %v5073_v3, %v5071_v59 }
0x1a4d   :  { %v3700_v2 = vpop.xlane.xlu1 %3699 }
0x1a4e   :  { %v3702_v4 = vsub.f32 %v3694_v1, %v3700_v2 }
0x1a50   :  { %v3705_v9 = vmul.f32 1.442695, %v3702_v4 }
0x1a51   :  { %v3718_v15 = vpop.permute.xlu1 %3717 }
0x1a52   :  { %5074 = vpow2.f32 %v3705_v9  ;;  %4838 = vmatpush3.msra.mxu1 %v3718_v15  ;;  %v4435_v15 = vld [vmem:[%s5786_s5 + $0x50] sm:$0xff] }
0x1a53   :  { %4840 = vmatmul.mubr.msk.f32.vlgmr.msra.gmra.mrb[44].mxu1 %vm135_vm2, %v3715_v13  ;;  %v4949_v13 = vpack.c.bf16 %v4434_v33, %v4433_v32  ;;  %v4233_v32 = vrot.slane %v5513_v5, %v2092_v55  ;;  %v4379_v55 = vld [vmem:[%s5788_s8] ss:$0 sm:$0xff] }
0x1a5c   :  { %v5075_v18 = vpop.eup %5074 }
0x1a5d   :  { %v3710_v6 = vsel %vm135_vm2, %v5075_v18, 0.0 }
0x1a5e   :  { %3711 = vadd.xlane.f32.xlu0 %v3710_v6  ;;  %v4438_v6 = vld [vmem:[%s5786_s5 + $0x68] sm:$0xff] }
0x1a74   :  { %3793 = vrot.lane.b32.xlu0 %v5518_v23, %s5104_s22 }
0x1aeb   :  { %v3712_v25 = vpop.xlane.xlu0 %3711 }
0x1aec   :  { %5076 = vrcp.f32 %v3712_v25 }
0x1aef   :  { %v3794_v20 = vpop.permute.xlu0 %3793 }
0x1af0   :  { %4843 = vmatpush3.msra.mxu0 %v3794_v20  ;;  %v4440_v20 = vld [vmem:[%s5786_s5 + $0x78] sm:$0xff] }
0x1af1   :  { %4847 = vmatprep.subr.mxu0 %v4424_v19 }
0x1af6   :  { %v5077_v24 = vpop.eup %5076 }
0x1af7   :  { %v3716_v27 = vmul.f32 %v5077_v24, %v5075_v18  ;;  %v4437_v18 = vld [vmem:[%s5786_s5 + $0x60] sm:$0xff] }
0x1af8   :  { %v4957_v25 = vpack.c.bf16 %v4438_v6, %v4437_v18 }
0x1af9   :  { %4845 = vmatmul.mubr.msk.f32.vlgmr.msra.gmra.mrb[30].mxu0 %vm135_vm2, %v3716_v27  ;;  %v4008_v27 = vrot.slane %v5513_v5, %v1867_v56 }
0x1afa   :  { %4848 = vmatpush3.msra.mxu0 %v4424_v19  ;;  %v4439_v19 = vld [vmem:[%s5786_s5 + $0x70] sm:$0xff] }
0x1afb   :  { %4950 = vmatprep.subr.bf16.mxu0 %v4949_v13  ;;  %v4961_v24 = vpack.c.bf16 %v4440_v20, %v4439_v19 }
0x1b26   :  { %v3789_v28 = vpop.f32.mrb[44].mxu1 }
0x1b27   :  { %v4841_v11 = vpop.f32.mrb[45].mxu1  ;;  %4849 = vmatprep.mubr.msk.f32.mxu0 %vm135_vm2, %v3789_v28 }
0x1bcc   :  { %v3865_v29 = vpop.f32.mrb[30].mxu0 }
0x1bcd   :  { %v4846_v23 = vpop.f32.mrb[31].mxu0  ;;  %4850 = vmatmul.mubr.msk.f32.vlgmr.msra.gmra.mrb[24].mxu0 %vm135_vm2, %v3865_v29 }
0x1bce   :  { %4952 = vmatpush3.bf16.msra.mxu0 %v4949_v13 }
0x1ca0   :  { %v4851_v34 = vpop.f32.mrb[24].mxu0 }
0x1ca1   :  { %v3959_v35 = vadd.f32 %v4851_v34, %v3957_v30  ;;  %v3943_v36 = vpop.f32.mrb[25].mxu0 }
0x1ca2   :  { %v3958_v37 = vadd.f32 %v3957_v30, %v3943_v36 }
0x1ca3   :  { %v3961_v38 = vadd.f32 %v5503_v12, %v3959_v35 }
0x1ca4   :  { %v3960_v39 = vadd.f32 %v5494_v7, %v3958_v37  ;;  %v4427_v7 = vld [vmem:[%s5785_s4 + $0x20] sm:$0xff] }
0x1ca5   :  { %v3965_v14 = vsel %vm50_vm0, %v3961_v38, 0.0  ;;  %v4941_v48 = vpack.c.bf16 %v4428_v46, %v4427_v7 }
0x1ca6   :  { %3966 = vadd.xlane.f32.xlu0 %v3965_v14  ;;  %v3962_v26 = vsel %vm50_vm0, %v3960_v39, 0.0 }
0x1ca7   :  { %3963 = vadd.xlane.f32.xlu1 %v3962_v26  ;;  %4942 = vmatprep.subr.bf16.mxu1 %v4941_v48 }
0x1ca8   :  { %4944 = vmatpush3.bf16.msra.mxu1 %v4941_v48 }
0x1ca9   :  { %4946 = vmatprep.subr.bf16.mxu1 %v4945_v51 }
0x1cac   :  { %4948 = vmatpush3.bf16.msra.mxu1 %v4945_v51 }
0x1cad   :  { %4966 = vmatprep.subr.bf16.mxu1 %v5457_v47 }
0x1d33   :  { %v3967_v0 = vpop.xlane.xlu0 %3966 }
0x1d34   :  { %v3969_v40 = vmul.f32 0.03125, %v3967_v0  ;;  %v3964_v41 = vpop.xlane.xlu1 %3963 }
0x1d35   :  { %v3968_v44 = vmul.f32 0.03125, %v3964_v41 }
0x1d36   :  { %v3971_v21 = vsub.f32 %v3961_v38, %v3969_v40 }
0x1d37   :  { %v3970_v57 = vsub.f32 %v3960_v39, %v3968_v44 }
0x1d38   :  { %v3973_v45 = vmul.f32 %v3971_v21, %v3971_v21 }
0x1d39   :  { %v3972_v43 = vmul.f32 %v3970_v57, %v3970_v57 }
0x1d3a   :  { %v3977_v42 = vsel %vm50_vm0, %v3973_v45, 0.0 }
0x1d3b   :  { %3978 = vadd.xlane.f32.xlu0 %v3977_v42  ;;  %v3974_v12 = vsel %vm50_vm0, %v3972_v43, 0.0  ;;  %v4120_v42 = vrot.slane %v5513_v5, %v1978_v22 }
0x1d3c   :  { %3975 = vadd.xlane.f32.xlu1 %v3974_v12 }
0x1dc8   :  { %v3979_v52 = vpop.xlane.xlu0 %3978 }
0x1dc9   :  { %v3981_v53 = vmul.f32 0.03125, %v3979_v52  ;;  %v3976_v54 = vpop.xlane.xlu1 %3975 }
0x1dca   :  { %v3980_v17 = vmul.f32 0.03125, %v3976_v54 }
0x1dcb   :  { %v3983_v59 = vadd.f32 1e-12, %v3981_v53 }
0x1dcc   :  { %v3982_v60 = vadd.f32 1e-12, %v3980_v17 }
0x1dcd   :  { %5078 = vrsqrt.f32 %v3983_v59 }
0x1dce   :  { %5080 = vrsqrt.f32 %v3982_v60 }
0x1dd7   :  { %v5079_v63 = vpop.eup %5078 }
0x1dd8   :  { %v5081_v58 = vpop.eup %5080  ;;  %v3987_v1 = vmul.f32 %v5079_v63, %v3971_v21 }
0x1dd9   :  { %v3986_v8 = vmul.f32 %v5081_v58, %v3970_v57 }
0x1dda   :  { %v3993_v2 = vmul.f32 %v3991_v61, %v3987_v1 }
0x1ddb   :  { %v3992_v3 = vmul.f32 %v3991_v61, %v3986_v8 }
0x1ddc   :  { %v3999_v9 = vadd.f32 %v3997_v31, %v3993_v2 }
0x1ddd   :  { %v3998_v4 = vadd.f32 %v3997_v31, %v3992_v3 }
0x1ddf   :  { %4860 = vmatprep.mubr.msk.f32.mxu1 %vm50_vm0, %v3998_v4 }
0x1de0   :  { %4861 = vmatmul.mubr.msk.f32.vlgmr.msra.gmra.mrb[46].mxu1 %vm50_vm0, %v3999_v9 }
0x1de1   :  { %4968 = vmatpush3.bf16.msra.mxu1 %v5457_v47  ;;  %v4436_v47 = vld [vmem:[%s5786_s5 + $0x58] sm:$0xff] }
0x1de2   :  { %4970 = vmatprep.subr.bf16.mxu1 %v5467_v49 }
0x1de5   :  { %4972 = vmatpush3.bf16.msra.mxu1 %v5467_v49  ;;  %v4953_v49 = vpack.c.bf16 %v4436_v47, %v4435_v15 }
0x1de7   :  { %4954 = vmatprep.subr.bf16.mxu0 %v4953_v49 }
0x1de8   :  { %4956 = vmatpush3.bf16.msra.mxu0 %v4953_v49  ;;  %v4239_v49 = vrot.slane %v5513_v5, %v2098_v62 }
0x1de9   :  { %4958 = vmatprep.subr.bf16.mxu0 %v4957_v25 }
0x1dec   :  { %4960 = vmatpush3.bf16.msra.mxu0 %v4957_v25 }
0x1ded   :  { %4962 = vmatprep.subr.bf16.mxu0 %v4961_v24 }
0x1df0   :  { %4964 = vmatpush3.bf16.msra.mxu0 %v4961_v24 }
0x1eb3   :  { %v4862_v28 = vpop.f32.mrb[46].mxu1 }
0x1eb4   :  { %v4087_v11 = vadd.f32 %v4862_v28, %v4008_v27  ;;  %v4081_v29 = vpop.f32.mrb[47].mxu1 }
0x1eb5   :  { %v4082_v23 = vadd.f32 %v4081_v29, %v4008_v27 }
0x1eb6   :  { %v4091_v30 = vmul.f32 %v4087_v11, %v4087_v11 }
0x1eb7   :  { %v4090_v34 = vmul.f32 %v4082_v23, %v4082_v23 }
0x1eb8   :  { %v4093_v35 = vmul.f32 %v4091_v30, %v4087_v11 }
0x1eb9   :  { %v4092_v36 = vmul.f32 %v4090_v34, %v4082_v23 }
0x1eba   :  { %v4095_v37 = vmul.f32 0.044715, %v4093_v35 }
0x1ebb   :  { %v4094_v38 = vmul.f32 0.044715, %v4092_v36 }
0x1ebc   :  { %v4097_v39 = vadd.f32 %v4095_v37, %v4087_v11 }
0x1ebd   :  { %v4096_v14 = vadd.f32 %v4094_v38, %v4082_v23 }
0x1ebe   :  { %v4099_v26 = vmul.f32 0.7978846, %v4097_v39 }
0x1ebf   :  { %v4098_v0 = vmul.f32 0.7978846, %v4096_v14 }
0x1ec0   :  { %5082 = vtanh.f32 %v4099_v26 }
0x1ec1   :  { %5084 = vtanh.f32 %v4098_v0 }
0x1eca   :  { %v5083_v40 = vpop.eup %5082 }
0x1ecb   :  { %v5085_v41 = vpop.eup %5084  ;;  %v4103_v44 = vadd.f32 1.0, %v5083_v40 }
0x1ecc   :  { %v4102_v56 = vadd.f32 1.0, %v5085_v41 }
0x1ecd   :  { %v4105_v21 = vmul.f32 0.5, %v4103_v44 }
0x1ece   :  { %v4104_v57 = vmul.f32 0.5, %v4102_v56 }
0x1ecf   :  { %v4107_v43 = vmul.f32 %v4105_v21, %v4087_v11 }
0x1ed0   :  { %v4106_v45 = vmul.f32 %v4104_v57, %v4082_v23 }
0x1ed2   :  { %4879 = vmatprep.mubr.msk.f32.mxu0 %vm1980_vm3, %v4106_v45 }
0x1ed3   :  { %4880 = vmatmul.mubr.msk.f32.vlgmr.msra.gmra.mrb[32].mxu0 %vm1980_vm3, %v4107_v43 }
0x1fa6   :  { %v4881_v12 = vpop.f32.mrb[32].mxu0 }
0x1fa7   :  { %v4199_v7 = vadd.f32 %v4881_v12, %v4120_v42  ;;  %v4193_v46 = vpop.f32.mrb[33].mxu0 }
0x1fa8   :  { %v4194_v48 = vadd.f32 %v4193_v46, %v4120_v42 }
0x1fa9   :  { %v4203_v16 = vadd.f32 %v4199_v7, %v3999_v9 }
0x1faa   :  { %v4202_v50 = vadd.f32 %v4194_v48, %v3998_v4 }
0x1fab   :  { %v4207_v51 = vsel %vm50_vm0, %v4203_v16, 0.0 }
0x1fac   :  { %4208 = vadd.xlane.f32.xlu0 %v4207_v51  ;;  %v4204_v52 = vsel %vm50_vm0, %v4202_v50, 0.0 }
0x1fad   :  { %4205 = vadd.xlane.f32.xlu1 %v4204_v52 }
0x2039   :  { %v4209_v53 = vpop.xlane.xlu0 %4208 }
0x203a   :  { %v4211_v54 = vmul.f32 0.03125, %v4209_v53  ;;  %v4206_v17 = vpop.xlane.xlu1 %4205 }
0x203b   :  { %v4210_v59 = vmul.f32 0.03125, %v4206_v17 }
0x203c   :  { %v4213_v60 = vsub.f32 %v4203_v16, %v4211_v54 }
0x203d   :  { %v4212_v61 = vsub.f32 %v4202_v50, %v4210_v59 }
0x203e   :  { %v4215_v63 = vmul.f32 %v4213_v60, %v4213_v60 }
0x203f   :  { %v4214_v22 = vmul.f32 %v4212_v61, %v4212_v61 }
0x2040   :  { %v4219_v58 = vsel %vm50_vm0, %v4215_v63, 0.0 }
0x2041   :  { %4220 = vadd.xlane.f32.xlu0 %v4219_v58  ;;  %v4216_v1 = vsel %vm50_vm0, %v4214_v22, 0.0 }
0x2042   :  { %4217 = vadd.xlane.f32.xlu1 %v4216_v1 }
0x20ce   :  { %v4221_v8 = vpop.xlane.xlu0 %4220 }
0x20cf   :  { %v4223_v31 = vmul.f32 0.03125, %v4221_v8  ;;  %v4218_v2 = vpop.xlane.xlu1 %4217 }
0x20d0   :  { %v4222_v3 = vmul.f32 0.03125, %v4218_v2 }
0x20d1   :  { %v4225_v4 = vadd.f32 1e-12, %v4223_v31 }
0x20d2   :  { %v4224_v9 = vadd.f32 1e-12, %v4222_v3 }
0x20d3   :  { %5086 = vrsqrt.f32 %v4225_v4 }
0x20d4   :  { %5088 = vrsqrt.f32 %v4224_v9 }
0x20dd   :  { %v5087_v33 = vpop.eup %5086 }
0x20de   :  { %v5089_v13 = vpop.eup %5088  ;;  %v4229_v15 = vmul.f32 %v5087_v33, %v4213_v60 }
0x20df   :  { %v4228_v47 = vmul.f32 %v5089_v13, %v4212_v61 }
0x20e0   :  { %v4235_v18 = vmul.f32 %v4233_v32, %v4229_v15 }
0x20e1   :  { %v4234_v6 = vmul.f32 %v4233_v32, %v4228_v47 }
0x20e2   :  { %v4241_v19 = vadd.f32 %v4239_v49, %v4235_v18 }
0x20e3   :  { %v4240_v25 = vadd.f32 %v4239_v49, %v4234_v6 }
0x20e5   :  { %4890 = vmatprep.mubr.msk.f32.mxu1 %vm50_vm0, %v4240_v25 }
0x20e6   :  { %4891 = vmatmul.mubr.msk.f32.vlgmr.msra.gmra.mrb[24].mxu1 %vm50_vm0, %v4241_v19 }
0x21b9   :  { %v4892_v20 = vpop.f32.mrb[24].mxu1 }
0x21ba   :  { %v4973_v24 = vadd.f32 %v4892_v20, %v4379_v55  ;;  %v4314_v27 = vpop.f32.mrb[25].mxu1 }
0x21bb   :  { %v4974_v28 = vadd.f32 %v4379_v55, %v4314_v27 }
0x21bc   :  { %v4326_v11 = vadd.f32 %v4973_v24, %v4379_v55 }
0x21bd   :  { %v4325_v10 = vadd.f32 %v4974_v28, %v4379_v55 }
0x21be   :  { %v4328_v62 = vmul.f32 0.5, %v4326_v11 }
0x21bf   :  { %v4327_v5 = vmul.f32 0.5, %v4325_v10 }
0x21c0   :  { %4331 = vst.msk [vmem:[%s5789_s9 + $0x8] sm:$0xff] %vm4329_vm4, %v4328_v62 }
0x21c1   :  { %4330 = vst.msk [vmem:[%s5789_s9] sm:$0xff] %vm4329_vm4, %v4327_v5 }

</bundles_post_ra>
